<compile_context>
chip_gen: v5e
topology: v5e:2x2
jax: 0.10.0
libtpu: 0.0.40
codegen_flags: <defaults>
</compile_context>

<pallas_src>
import functools

import jax
import jax.numpy as jnp
from jax.experimental import pallas as pl
from jax.experimental.pallas import tpu as pltpu

HID_SIZE = 256
_LANE = 128
_SUBLANE = 8


def _round_up(n, m):
    return ((n + m - 1) // m) * m


def _cdiv(a, b):
    return -(-a // b)


# ---------------------------------------------------------------------------
# Kernel
# ---------------------------------------------------------------------------
def _a2c_kernel(x_ref,
                w1_ref, b1_ref,
                w2_ref, b2_ref,
                w3_ref, b3_ref,
                wh_ref, bh_ref,
                out_ref,
                xpad_ref,
                *, act_size, obs_size):
    # --- zero-pad the (tb, obs_size) input tile to 128 lanes in VMEM ---
    # (input DMA stays at the true obs width; only VMEM sees the padded slab)
    xpad_ref[...] = jnp.zeros_like(xpad_ref)
    xpad_ref[:, :obs_size] = x_ref[...]
    x = xpad_ref[...].astype(jnp.bfloat16)

    # --- base MLP: obs_p -> 512 -> 384 -> 256 (zero-padded, ReLU-inert) ---
    # bf16 MXU operands, f32 accumulation, f32 bias/ReLU.
    h = jnp.dot(x, w1_ref[...], preferred_element_type=jnp.float32) + b1_ref[...]
    h = jnp.maximum(h, 0.0)
    h = jnp.dot(h.astype(jnp.bfloat16), w2_ref[...],
                preferred_element_type=jnp.float32) + b2_ref[...]
    h = jnp.maximum(h, 0.0)
    h = jnp.dot(h.astype(jnp.bfloat16), w3_ref[...],
                preferred_element_type=jnp.float32) + b3_ref[...]
    base = jnp.maximum(h, 0.0)

    # --- fused heads: one (256, 128) matmul for [mu | var | value | pad] ---
    heads = jnp.dot(base.astype(jnp.bfloat16), wh_ref[...],
                    preferred_element_type=jnp.float32) + bh_ref[...]

    # Per-lane activation selection with (1, head_p) masks (broadcast by where):
    #   lanes [0, act)      -> tanh      (mu)
    #   lanes [act, 2*act)  -> softplus  (var), stable: max(v,0)+log1p(exp(-|v|))
    #   lanes [2*act, ...)  -> identity  (value + padding, sliced off in wrapper)
    lane = jax.lax.broadcasted_iota(jnp.int32, (1, heads.shape[-1]), 1)
    mu_mask = lane < act_size
    var_mask = lane < 2 * act_size
    tanh_out = jnp.tanh(heads)
    softplus_out = jnp.maximum(heads, 0.0) + jnp.log1p(jnp.exp(-jnp.abs(heads)))
    out_ref[...] = jnp.where(mu_mask, tanh_out,
                             jnp.where(var_mask, softplus_out, heads))


# ---------------------------------------------------------------------------
# Host-side packing: pad to 128-lane multiples, fuse head weights, bf16 weights.
# ---------------------------------------------------------------------------
def pack_params(params, obs_size, act_size, weight_dtype=jnp.bfloat16):
    obs_p = _round_up(obs_size, _LANE)           # e.g. 28  -> 128
    h1_p = _round_up(400, _LANE)                 # 400 -> 512
    h2_p = _round_up(300, _LANE)                 # 300 -> 384
    h3_p = _round_up(HID_SIZE, _LANE)            # 256 -> 256
    head_p = _round_up(2 * act_size + 1, _LANE)  # e.g. 17 -> 128

    def pad2(a, rows, cols, dtype):
        a = jnp.pad(a, ((0, rows - a.shape[0]), (0, cols - a.shape[1])))
        return a.astype(dtype)

    w1 = pad2(params["w1"], obs_p, h1_p, weight_dtype)
    b1 = pad2(params["b1"], 1, h1_p, jnp.float32)
    w2 = pad2(params["w2"], h1_p, h2_p, weight_dtype)
    b2 = pad2(params["b2"], 1, h2_p, jnp.float32)
    w3 = pad2(params["w3"], h2_p, h3_p, weight_dtype)
    b3 = pad2(params["b3"], 1, h3_p, jnp.float32)

    wh = jnp.concatenate([params["wmu"], params["wvar"], params["wval"]], axis=1)
    bh = jnp.concatenate([params["bmu"], params["bvar"], params["bval"]], axis=1)
    wh = pad2(wh, h3_p, head_p, weight_dtype)
    bh = pad2(bh, 1, head_p, jnp.float32)

    return (w1, b1, w2, b2, w3, b3, wh, bh), (obs_p, head_p)


# ---------------------------------------------------------------------------
# Wrapper
# ---------------------------------------------------------------------------
def model_a2c_forward(x, params, *, block_b=1024, min_grid_steps=4):
    """x: (B, obs_size) f32.  params: dict of (in,out) weights and (1,out) biases."""
    B, obs_size = x.shape
    act_size = params["wmu"].shape[1]

    packed, (obs_p, head_p) = pack_params(params, obs_size, act_size)
    w1, b1, w2, b2, w3, b3, wh, bh = packed
    h1_p, h2_p, h3_p = w1.shape[1], w2.shape[1], w3.shape[1]

    # Batch tiling: aim for >= min_grid_steps grid steps (v7x megacore + pipeline
    # overlap), tile a multiple of 8 rows, capped at block_b for VMEM sanity.
    tb = _round_up(max(_cdiv(B, min_grid_steps), _SUBLANE), _SUBLANE)
    tb = min(tb, _round_up(block_b, _SUBLANE))
    b_p = _round_up(B, tb)
    x_p = jnp.pad(x, ((0, b_p - B), (0, 0)))   # pad batch rows only (obs stays narrow)

    grid = (b_p // tb,)

    def resident_spec(shape):
        # Constant block index -> stays resident in VMEM across grid steps.
        return pl.BlockSpec(shape, lambda i: (0, 0))

    in_specs = [pl.BlockSpec((tb, obs_size), lambda i: (i, 0))] + \
               [resident_spec(a.shape) for a in packed]
    out_spec = pl.BlockSpec((tb, head_p), lambda i: (i, 0))

    kernel = functools.partial(_a2c_kernel, act_size=act_size, obs_size=obs_size)

    flops = 2 * b_p * (obs_p * h1_p + h1_p * h2_p + h2_p * h3_p + h3_p * head_p)
    transcendentals = 3 * b_p * head_p  # tanh + exp + log1p on the head slab
    bytes_accessed = (x_p.size * x_p.dtype.itemsize
                      + sum(a.size * a.dtype.itemsize for a in packed)
                      + b_p * head_p * 4)

    out = pl.pallas_call(
        kernel,
        grid=grid,
        out_shape=jax.ShapeDtypeStruct((b_p, head_p), jnp.float32),
        in_specs=in_specs,
        out_specs=out_spec,
        scratch_shapes=[pltpu.VMEM((tb, obs_p), jnp.float32)],
        compiler_params=pltpu.CompilerParams(
            dimension_semantics=("parallel",),
            vmem_limit_bytes=32 * 1024 * 1024),
        cost_estimate=pl.CostEstimate(flops=flops,
                                      transcendentals=transcendentals,
                                      bytes_accessed=bytes_accessed),
    )(x_p, *packed)

    mu = out[:B, :act_size]
    var = out[:B, act_size:2 * act_size]
    value = out[:B, 2 * act_size:2 * act_size + 1]
    return mu, var, value


# ---------------------------------------------------------------------------
# Params / reference
# ---------------------------------------------------------------------------
def init_params(key, obs_size, act_size):
    """Deterministic synthetic init (uniform, torch-Linear-like fan-in scaling)."""
    def linear(key, fan_in, fan_out):
        kw, kb = jax.random.split(key)
        bound = 1.0 / jnp.sqrt(fan_in)
        w = jax.random.uniform(kw, (fan_in, fan_out), jnp.float32, -bound, bound)
        b = jax.random.uniform(kb, (1, fan_out), jnp.float32, -bound, bound)
        return w, b

    keys = jax.random.split(key, 6)
    w1, b1 = linear(keys[0], obs_size, 400)
    w2, b2 = linear(keys[1], 400, 300)
    w3, b3 = linear(keys[2], 300, HID_SIZE)
    wmu, bmu = linear(keys[3], HID_SIZE, act_size)
    wvar, bvar = linear(keys[4], HID_SIZE, act_size)
    wval, bval = linear(keys[5], HID_SIZE, 1)
    return dict(w1=w1, b1=b1, w2=w2, b2=b2, w3=w3, b3=b3,
                wmu=wmu, bmu=bmu, wvar=wvar, bvar=bvar, wval=wval, bval=bval)


def reference_forward(x, p):
    """Pure-JAX f32 reference for correctness check."""
    h = jnp.maximum(x @ p["w1"] + p["b1"], 0.0)
    h = jnp.maximum(h @ p["w2"] + p["b2"], 0.0)
    base = jnp.maximum(h @ p["w3"] + p["b3"], 0.0)
    mu = jnp.tanh(base @ p["wmu"] + p["bmu"])
    var = jax.nn.softplus(base @ p["wvar"] + p["bvar"])
    value = base @ p["wval"] + p["bval"]
    return mu, var, value


if __name__ == "__main__":
    obs_size = 28   # MuJoCo Ant observation dim
    act_size = 8    # MuJoCo Ant action dim
    batch = 4

    key = jax.random.PRNGKey(0)
    kx, kp = jax.random.split(key)
    x = jax.random.normal(kx, (batch, obs_size), jnp.float32)
    params = init_params(kp, obs_size, act_size)

    mu, var, value = model_a2c_forward(x, params)
    jax.block_until_ready((mu, var, value))

    mu_r, var_r, val_r = reference_forward(x, params)
    assert mu.shape == (batch, act_size)
    assert var.shape == (batch, act_size)
    assert value.shape == (batch, 1)
    # bf16 MXU operands (f32 accumulation) -> relaxed tolerance vs f32 reference.
    assert jnp.allclose(mu, mu_r, atol=5e-2, rtol=5e-2)
    assert jnp.allclose(var, var_r, atol=5e-2, rtol=5e-2)
    assert jnp.allclose(value, val_r, atol=5e-2, rtol=5e-2)

    print("KERNEL_OK")
</pallas_src>

<mosaic_0001>
module attributes {stable_mosaic.version = 11 : i64} {
  func.func @_a2c_kernel(%arg0: i32, %arg1: memref<8x28xf32, #tpu.memory_space<vmem>>, %arg2: memref<128x512xbf16, #tpu.memory_space<vmem>>, %arg3: memref<1x512xf32, #tpu.memory_space<vmem>>, %arg4: memref<512x384xbf16, #tpu.memory_space<vmem>>, %arg5: memref<1x384xf32, #tpu.memory_space<vmem>>, %arg6: memref<384x256xbf16, #tpu.memory_space<vmem>>, %arg7: memref<1x256xf32, #tpu.memory_space<vmem>>, %arg8: memref<256x128xbf16, #tpu.memory_space<vmem>>, %arg9: memref<1x128xf32, #tpu.memory_space<vmem>>, %arg10: memref<8x128xf32, #tpu.memory_space<vmem>>, %arg11: memref<8x128xf32, #tpu.memory_space<vmem>>) attributes {dimension_semantics = [#tpu.dimension_semantics<parallel>], iteration_bounds = array<i64: 1>, scalar_prefetch = 0 : i64, scratch_operands = 1 : i64, tpu.core_type = #tpu.core_type<tc>, window_params = [{transform_indices = @transform_0, window_bounds = array<i64: 8, 28>}, {pipeline_mode = #tpu.pipeline_mode<synchronous>, transform_indices = @transform_1, window_bounds = array<i64: 128, 512>}, {pipeline_mode = #tpu.pipeline_mode<synchronous>, transform_indices = @transform_2, window_bounds = array<i64: 1, 512>}, {pipeline_mode = #tpu.pipeline_mode<synchronous>, transform_indices = @transform_3, window_bounds = array<i64: 512, 384>}, {pipeline_mode = #tpu.pipeline_mode<synchronous>, transform_indices = @transform_4, window_bounds = array<i64: 1, 384>}, {pipeline_mode = #tpu.pipeline_mode<synchronous>, transform_indices = @transform_5, window_bounds = array<i64: 384, 256>}, {pipeline_mode = #tpu.pipeline_mode<synchronous>, transform_indices = @transform_6, window_bounds = array<i64: 1, 256>}, {pipeline_mode = #tpu.pipeline_mode<synchronous>, transform_indices = @transform_7, window_bounds = array<i64: 256, 128>}, {pipeline_mode = #tpu.pipeline_mode<synchronous>, transform_indices = @transform_8, window_bounds = array<i64: 1, 128>}, {transform_indices = @transform_9, window_bounds = array<i64: 8, 128>}]} {
    %cst = arith.constant 0.000000e+00 : f32
    %0 = vector.broadcast %cst : f32 to vector<8x128xf32>
    %c0 = arith.constant 0 : index
    %c0_0 = arith.constant 0 : index
    %1 = vector.load %arg11[%c0, %c0_0] : memref<8x128xf32, #tpu.memory_space<vmem>>, vector<8x128xf32>
    tpu.vector_store %arg11[%c0, %c0_0], %0 {strides = array<i32>} : memref<8x128xf32, #tpu.memory_space<vmem>>, vector<8x128xf32>,
    %c0_1 = arith.constant 0 : index
    %c0_2 = arith.constant 0 : index
    %2 = vector.load %arg1[%c0_1, %c0_2] : memref<8x28xf32, #tpu.memory_space<vmem>>, vector<8x28xf32>
    %c0_3 = arith.constant 0 : index
    %c0_4 = arith.constant 0 : index
    %3 = vector.load %arg11[%c0_3, %c0_4] : memref<8x128xf32, #tpu.memory_space<vmem>>, vector<8x28xf32>
    tpu.vector_store %arg11[%c0_3, %c0_4], %2 {strides = array<i32>} : memref<8x128xf32, #tpu.memory_space<vmem>>, vector<8x28xf32>,
    %c0_5 = arith.constant 0 : index
    %c0_6 = arith.constant 0 : index
    %4 = vector.load %arg11[%c0_5, %c0_6] : memref<8x128xf32, #tpu.memory_space<vmem>>, vector<8x128xf32>
    %5 = arith.truncf %4 : vector<8x128xf32> to vector<8x128xbf16>
    %c0_7 = arith.constant 0 : index
    %c0_8 = arith.constant 0 : index
    %6 = vector.load %arg2[%c0_7, %c0_8] : memref<128x512xbf16, #tpu.memory_space<vmem>>, vector<128x512xbf16>
    %cst_9 = arith.constant dense<0.000000e+00> : vector<8x512xf32>
    %7 = tpu.matmul %5, %6, %cst_9 {dimension_numbers = #tpu.dot_dimension_numbers<[1], [0], [0], [1], [0, 0, 1, 1], [], []>} : vector<8x128xbf16>, vector<128x512xbf16>, vector<8x512xf32> -> vector<8x512xf32>
    %c0_10 = arith.constant 0 : index
    %c0_11 = arith.constant 0 : index
    %8 = vector.load %arg3[%c0_10, %c0_11] : memref<1x512xf32, #tpu.memory_space<vmem>>, vector<1x512xf32>
    %9 = vector.broadcast %8 : vector<1x512xf32> to vector<8x512xf32>
    %10 = arith.addf %7, %9 : vector<8x512xf32>
    %cst_12 = arith.constant 0.000000e+00 : f32
    %11 = vector.broadcast %cst_12 : f32 to vector<8x512xf32>
    %12 = arith.maximumf %10, %11 : vector<8x512xf32>
    %13 = arith.truncf %12 : vector<8x512xf32> to vector<8x512xbf16>
    %c0_13 = arith.constant 0 : index
    %c0_14 = arith.constant 0 : index
    %14 = vector.load %arg4[%c0_13, %c0_14] : memref<512x384xbf16, #tpu.memory_space<vmem>>, vector<512x384xbf16>
    %cst_15 = arith.constant dense<0.000000e+00> : vector<8x384xf32>
    %15 = tpu.matmul %13, %14, %cst_15 {dimension_numbers = #tpu.dot_dimension_numbers<[1], [0], [0], [1], [0, 0, 1, 1], [], []>} : vector<8x512xbf16>, vector<512x384xbf16>, vector<8x384xf32> -> vector<8x384xf32>
    %c0_16 = arith.constant 0 : index
    %c0_17 = arith.constant 0 : index
    %16 = vector.load %arg5[%c0_16, %c0_17] : memref<1x384xf32, #tpu.memory_space<vmem>>, vector<1x384xf32>
    %17 = vector.broadcast %16 : vector<1x384xf32> to vector<8x384xf32>
    %18 = arith.addf %15, %17 : vector<8x384xf32>
    %cst_18 = arith.constant 0.000000e+00 : f32
    %19 = vector.broadcast %cst_18 : f32 to vector<8x384xf32>
    %20 = arith.maximumf %18, %19 : vector<8x384xf32>
    %21 = arith.truncf %20 : vector<8x384xf32> to vector<8x384xbf16>
    %c0_19 = arith.constant 0 : index
    %c0_20 = arith.constant 0 : index
    %22 = vector.load %arg6[%c0_19, %c0_20] : memref<384x256xbf16, #tpu.memory_space<vmem>>, vector<384x256xbf16>
    %cst_21 = arith.constant dense<0.000000e+00> : vector<8x256xf32>
    %23 = tpu.matmul %21, %22, %cst_21 {dimension_numbers = #tpu.dot_dimension_numbers<[1], [0], [0], [1], [0, 0, 1, 1], [], []>} : vector<8x384xbf16>, vector<384x256xbf16>, vector<8x256xf32> -> vector<8x256xf32>
    %c0_22 = arith.constant 0 : index
    %c0_23 = arith.constant 0 : index
    %24 = vector.load %arg7[%c0_22, %c0_23] : memref<1x256xf32, #tpu.memory_space<vmem>>, vector<1x256xf32>
    %25 = vector.broadcast %24 : vector<1x256xf32> to vector<8x256xf32>
    %26 = arith.addf %23, %25 : vector<8x256xf32>
    %cst_24 = arith.constant 0.000000e+00 : f32
    %27 = vector.broadcast %cst_24 : f32 to vector<8x256xf32>
    %28 = arith.maximumf %26, %27 : vector<8x256xf32>
    %29 = arith.truncf %28 : vector<8x256xf32> to vector<8x256xbf16>
    %c0_25 = arith.constant 0 : index
    %c0_26 = arith.constant 0 : index
    %30 = vector.load %arg8[%c0_25, %c0_26] : memref<256x128xbf16, #tpu.memory_space<vmem>>, vector<256x128xbf16>
    %cst_27 = arith.constant dense<0.000000e+00> : vector<8x128xf32>
    %31 = tpu.matmul %29, %30, %cst_27 {dimension_numbers = #tpu.dot_dimension_numbers<[1], [0], [0], [1], [0, 0, 1, 1], [], []>} : vector<8x256xbf16>, vector<256x128xbf16>, vector<8x128xf32> -> vector<8x128xf32>
    %c0_28 = arith.constant 0 : index
    %c0_29 = arith.constant 0 : index
    %32 = vector.load %arg9[%c0_28, %c0_29] : memref<1x128xf32, #tpu.memory_space<vmem>>, vector<1x128xf32>
    %33 = vector.broadcast %32 : vector<1x128xf32> to vector<8x128xf32>
    %34 = arith.addf %31, %33 : vector<8x128xf32>
    %35 = tpu.iota {dimensions = array<i32: 1>} : vector<1x128xi32>
    %c8_i32 = arith.constant 8 : i32
    %36 = vector.broadcast %c8_i32 : i32 to vector<1x128xi32>
    %37 = arith.cmpi slt, %35, %36 : vector<1x128xi32>
    %c16_i32 = arith.constant 16 : i32
    %38 = vector.broadcast %c16_i32 : i32 to vector<1x128xi32>
    %39 = arith.cmpi slt, %35, %38 : vector<1x128xi32>
    %40 = math.tanh %34 : vector<8x128xf32>
    %cst_30 = arith.constant 0.000000e+00 : f32
    %41 = vector.broadcast %cst_30 : f32 to vector<8x128xf32>
    %42 = arith.maximumf %34, %41 : vector<8x128xf32>
    %43 = math.absf %34 : vector<8x128xf32>
    %cst_31 = arith.constant 0.000000e+00 : f32
    %44 = vector.broadcast %cst_31 : f32 to vector<8x128xf32>
    %45 = arith.subf %44, %43 : vector<8x128xf32>
    %46 = math.exp %45 : vector<8x128xf32>
    %47 = math.log1p %46 : vector<8x128xf32>
    %48 = arith.addf %42, %47 : vector<8x128xf32>
    %49 = vector.shape_cast %39 : vector<1x128xi1> to vector<1x128xi1>
    %50 = vector.broadcast %49 : vector<1x128xi1> to vector<8x128xi1>
    %51 = arith.select %50, %48, %34 : vector<8x128xi1>, vector<8x128xf32>
    %52 = vector.shape_cast %37 : vector<1x128xi1> to vector<1x128xi1>
    %53 = vector.broadcast %52 : vector<1x128xi1> to vector<8x128xi1>
    %54 = arith.select %53, %40, %51 : vector<8x128xi1>, vector<8x128xf32>
    %c0_32 = arith.constant 0 : index
    %c0_33 = arith.constant 0 : index
    %55 = vector.load %arg10[%c0_32, %c0_33] : memref<8x128xf32, #tpu.memory_space<vmem>>, vector<8x128xf32>
    tpu.vector_store %arg10[%c0_32, %c0_33], %54 {strides = array<i32>} : memref<8x128xf32, #tpu.memory_space<vmem>>, vector<8x128xf32>,
    return
  }
  func.func @transform_0(%arg0: i32) -> (i32, i32) {
    %c0_i32 = arith.constant 0 : i32
    %c0_i32_0 = arith.constant 0 : i32
    return %arg0, %c0_i32 : i32, i32
  }
  func.func @transform_1(%arg0: i32) -> (i32, i32) {
    %c0_i32 = arith.constant 0 : i32
    %c0_i32_0 = arith.constant 0 : i32
    %c0_i32_1 = arith.constant 0 : i32
    return %c0_i32, %c0_i32_0 : i32, i32
  }
  func.func @transform_2(%arg0: i32) -> (i32, i32) {
    %c0_i32 = arith.constant 0 : i32
    %c0_i32_0 = arith.constant 0 : i32
    %c0_i32_1 = arith.constant 0 : i32
    return %c0_i32, %c0_i32_0 : i32, i32
  }
  func.func @transform_3(%arg0: i32) -> (i32, i32) {
    %c0_i32 = arith.constant 0 : i32
    %c0_i32_0 = arith.constant 0 : i32
    %c0_i32_1 = arith.constant 0 : i32
    return %c0_i32, %c0_i32_0 : i32, i32
  }
  func.func @transform_4(%arg0: i32) -> (i32, i32) {
    %c0_i32 = arith.constant 0 : i32
    %c0_i32_0 = arith.constant 0 : i32
    %c0_i32_1 = arith.constant 0 : i32
    return %c0_i32, %c0_i32_0 : i32, i32
  }
  func.func @transform_5(%arg0: i32) -> (i32, i32) {
    %c0_i32 = arith.constant 0 : i32
    %c0_i32_0 = arith.constant 0 : i32
    %c0_i32_1 = arith.constant 0 : i32
    return %c0_i32, %c0_i32_0 : i32, i32
  }
  func.func @transform_6(%arg0: i32) -> (i32, i32) {
    %c0_i32 = arith.constant 0 : i32
    %c0_i32_0 = arith.constant 0 : i32
    %c0_i32_1 = arith.constant 0 : i32
    return %c0_i32, %c0_i32_0 : i32, i32
  }
  func.func @transform_7(%arg0: i32) -> (i32, i32) {
    %c0_i32 = arith.constant 0 : i32
    %c0_i32_0 = arith.constant 0 : i32
    %c0_i32_1 = arith.constant 0 : i32
    return %c0_i32, %c0_i32_0 : i32, i32
  }
  func.func @transform_8(%arg0: i32) -> (i32, i32) {
    %c0_i32 = arith.constant 0 : i32
    %c0_i32_0 = arith.constant 0 : i32
    %c0_i32_1 = arith.constant 0 : i32
    return %c0_i32, %c0_i32_0 : i32, i32
  }
  func.func @transform_9(%arg0: i32) -> (i32, i32) {
    %c0_i32 = arith.constant 0 : i32
    %c0_i32_0 = arith.constant 0 : i32
    return %arg0, %c0_i32 : i32, i32
  }
}

</mosaic_0001>

<bundles_post_ra>
// kernel: tpu_custom_call.1
= control target key start
LH: loop header
LB: loop body
LE: loop exit
PB: predicated region body
PF: predicated region fallthrough
CT: control target
= control target key end

     0   :  { %14 = vsyncpa [#allocation4], 0  ;;  %s3064_s0 = inlined_call_operand.hbm [shape: f32[8,28], index: 0, kind: input, shape index: {}]   ;;  %s3065_s1 = inlined_call_operand.hbm [shape: bf16[128,512], index: 1, kind: input, shape index: {}]   ;;  %s3066_s2 = inlined_call_operand.hbm [shape: f32[1,512], index: 2, kind: input, shape index: {}]   ;;  %s3067_s3 = inlined_call_operand.hbm [shape: bf16[512,384], index: 3, kind: input, shape index: {}]   ;;  %s3068_s4 = inlined_call_operand.vmem [shape: f32[1,384], index: 4, kind: input, shape index: {}]   ;;  %s3069_s5 = inlined_call_operand.hbm [shape: bf16[384,256], index: 5, kind: input, shape index: {}]   ;;  %s3070_s6 = inlined_call_operand.vmem [shape: f32[1,256], index: 6, kind: input, shape index: {}]   ;;  %s3071_s7 = inlined_call_operand.hbm [shape: bf16[256,128], index: 7, kind: input, shape index: {}]   ;;  %s3072_s8 = inlined_call_operand.vmem [shape: f32[1,128], index: 8, kind: input, shape index: {}]   ;;  %s3073_s9 = inlined_call_operand.hbm [shape: f32[8,128], index: 9, kind: output, shape index: {}]  }
   0x1   :  { %15 = vsyncpa [#allocation7], 0 }
   0x2   :  { %16 = vsyncpa [#allocation10], 0 }
   0x3   :  { %17 = vsyncpa [#allocation13], 0  ;;  %s34_s11 = sshll.u32 %s3065_s1, 4  ;;  %s35_s11 = int_to_ptr.hbm [resolvable:$true] %s34_s11 }
   0x4   :  { %18 = vsyncpa [#allocation5], 0  ;;  %s2943_s12 = smov [#allocation6]   ;;  %s58_s16 = sshll.u32 %s3067_s3, 4  ;;  %s59_s16 = int_to_ptr.hbm [resolvable:$true] %s58_s16 }
   0x5   :  { %s36_s13 = sshll.u32 %s2943_s12, 4  ;;  %s2944_s17 = smov 256   ;;  %s37_s13 = int_to_ptr.vmem [resolvable:$true] %s36_s13 }
   0x6   :  { %s2945_s18 = smov 16   ;;  %s2946_s19 = smov [#allocation9]  }
   0x7   :  { %42 = dma.hbm_to_vmem [thread:$0]  %s35_s11, 4096, %s37_s13, [#allocation7], %s2944_s17, %s2944_s17, %s2945_s18  }
   0x8   :  { %s60_s20 = sshll.u32 %s2946_s19, 4  ;;  %s2947_s21 = smov 192   ;;  %s61_s20 = int_to_ptr.vmem [resolvable:$true] %s60_s20 }
   0x9   :  { %s2948_s22 = smov 12   ;;  %s24_s24 = sshll.u32 %s3064_s0, 4  ;;  %s25_s24 = int_to_ptr.hbm [resolvable:$true] %s24_s24 }
   0xa   :  { %66 = dma.hbm_to_vmem [thread:$0]  %s59_s16, 12288, %s61_s20, [#allocation10], %s2947_s21, %s2947_s21, %s2948_s22  }
   0xb   :  { %s2949_s25 = smov [#allocation3]   ;;  %s48_s28 = sshll.u32 %s3066_s2, 4  ;;  %s49_s28 = int_to_ptr.hbm [resolvable:$true] %s48_s28 }
   0xc   :  { %s26_s26 = sshll.u32 %s2949_s25, 4  ;;  %s2950_s29 = smov [#allocation8]   ;;  %s27_s26 = int_to_ptr.vmem [resolvable:$true] %s26_s26 }
   0xd   :  { %29 = dma.hbm_to_vmem [thread:$0]  %s25_s24, 128, %s27_s26, [#allocation4]  }
   0xe   :  { %s50_s30 = sshll.u32 %s2950_s29, 4  ;;  %s73_s12 = sshll.u32 %s3069_s5, 4  ;;  %s51_s30 = int_to_ptr.vmem [resolvable:$true] %s50_s30  ;;  %s74_s12 = int_to_ptr.hbm [resolvable:$true] %s73_s12 }
   0xf   :  { %53 = dma.hbm_to_vmem [thread:$0]  %s49_s28, 64, %s51_s30, [#allocation7]  }
  0x10   :  { %s2951_s0 = smov [#allocation11]   ;;  %s88_s16 = sshll.u32 %s3071_s7, 4  ;;  %s89_s16 = int_to_ptr.hbm [resolvable:$true] %s88_s16 }
  0x11   :  { %s75_s13 = sshll.u32 %s2951_s0, 4  ;;  %s2952_s17 = smov 128   ;;  %s76_s13 = int_to_ptr.vmem [resolvable:$true] %s75_s13 }
  0x12   :  { %s2953_s2 = smov 8   ;;  %s2954_s18 = smov [#allocation12]  }
  0x13   :  { %81 = dma.hbm_to_vmem [thread:$0]  %s74_s12, 6144, %s76_s13, [#allocation10], %s2952_s17, %s2952_s17, %s2953_s2  }
  0x14   :  { %s90_s19 = sshll.u32 %s2954_s18, 4  ;;  %s2955_s20 = smov 64   ;;  %s91_s19 = int_to_ptr.vmem [resolvable:$true] %s90_s19 }
  0x15   :  { %s2956_s21 = smov 4  }
  0x16   :  { %96 = dma.hbm_to_vmem [thread:$0]  %s89_s16, 2048, %s91_s19, [#allocation13], %s2955_s20, %s2955_s20, %s2956_s21  }
  0x17   :  { %2933 = dma.done.wait [#allocation4], 128  }
  0x18   :  { %2934 = vsyncadd [#allocation4], 4294967168 }
  0x19   :  { %2935 = dma.done.wait [#allocation7], 4160  }
  0x1a   :  { %2936 = vsyncadd [#allocation7], 4294963136 }
  0x1b   :  { %2937 = dma.done.wait [#allocation10], 18432  }
  0x1c   :  { %2938 = vsyncadd [#allocation10], 4294948864 }
  0x1d   :  { %2939 = dma.done.wait [#allocation13], 2048  }
  0x1e   :  { %2940 = vsyncadd [#allocation13], 4294965248  ;;  %v2957_v0 = vmov 0.0   ;;  %v1896_v1 = vld [vmem:[#allocation6 + $0xe0] sm:$0xf]  ;;  %vm125_vm0 = vcmask 228352  }
  0x1f   :  { %123 = vst [vmem:[#allocation2] sm:$0xff] %v2957_v0  ;;  %v2580_v2 = vld [vmem:[#allocation6 + $0xec] sm:$0xf0]  ;;  %v2578_v3 = vld [vmem:[#allocation6 + $0xe4] sm:$0xf]  ;;  %s1769_s26 = sshll.u32 %s3073_s9, 4  ;;  %s1770_s26 = int_to_ptr.hbm [resolvable:$true] %s1769_s26 }
  0x20   :  { %v1897_v4 = vor.u32 %v2580_v2, %v1896_v1  ;;  %v1898_v5 = vld [vmem:[#allocation6 + $0xf0] sm:$0xf0]  ;;  %v1904_v6 = vld [vmem:[#allocation6 + $0xe8] sm:$0xf]  ;;  %v2581_v7 = vld [vmem:[#allocation6 + $0xf4] sm:$0xf0] }
  0x21   :  { %v1901_v8 = vor.u32 %v2578_v3, %v1898_v5  ;;  %v1905_v9 = vor.u32 %v2581_v7, %v1904_v6  ;;  %v2579_v10 = vld [vmem:[#allocation6 + $0xec] sm:$0xf]  ;;  %v1906_v11 = vld [vmem:[#allocation6 + $0xf8] sm:$0xf0]  ;;  %v1880_v12 = vld [vmem:[#allocation6 + $0xc0] sm:$0xf] }
  0x22   :  { %331 = vmatpush.bf16.msra.mxu0 %v1897_v4  ;;  %v1909_v13 = vor.u32 %v2579_v10, %v1906_v11  ;;  %v2576_v14 = vld [vmem:[#allocation6 + $0xcc] sm:$0xf0]  ;;  %v2574_v15 = vld [vmem:[#allocation6 + $0xc4] sm:$0xf]  ;;  %v1882_v16 = vld [vmem:[#allocation6 + $0xd0] sm:$0xf0] }
  0x23   :  { %344 = vmatpush.bf16.msra.mxu1 %v1901_v8  ;;  %357 = vmatpush.bf16.msra.mxu2 %v1905_v9  ;;  %v1881_v17 = vor.u32 %v2576_v14, %v1880_v12  ;;  %v1885_v18 = vor.u32 %v2574_v15, %v1882_v16  ;;  %v1888_v19 = vld [vmem:[#allocation6 + $0xc8] sm:$0xf]  ;;  %v2577_v20 = vld [vmem:[#allocation6 + $0xd4] sm:$0xf0]  ;;  %v2575_v21 = vld [vmem:[#allocation6 + $0xcc] sm:$0xf] }
  0x24   :  { %370 = vmatpush.bf16.msra.mxu3 %v1909_v13  ;;  %v1889_v22 = vor.u32 %v2577_v20, %v1888_v19  ;;  %v1890_v23 = vld [vmem:[#allocation6 + $0xd8] sm:$0xf0]  ;;  %v1864_v24 = vld [vmem:[#allocation6 + $0xa0] sm:$0xf]  ;;  %v2572_v25 = vld [vmem:[#allocation6 + $0xac] sm:$0xf0] }
  0x25   :  { %v1893_v26 = vor.u32 %v2575_v21, %v1890_v23  ;;  %v2570_v27 = vld [vmem:[#allocation6 + $0xa4] sm:$0xf]  ;;  %v1866_v28 = vld [vmem:[#allocation6 + $0xb0] sm:$0xf0]  ;;  %v1872_v29 = vld [vmem:[#allocation6 + $0xa8] sm:$0xf]  ;;  %v1865_v30 = vor.u32 %v2572_v25, %v1864_v24 }
  0x26   :  { %332 = vmatpush.bf16.msra.mxu0 %v1881_v17  ;;  %v2573_v31 = vld [vmem:[#allocation6 + $0xb4] sm:$0xf0]  ;;  %v2571_v32 = vld [vmem:[#allocation6 + $0xac] sm:$0xf]  ;;  %v1874_v33 = vld [vmem:[#allocation6 + $0xb8] sm:$0xf0]  ;;  %v1869_v34 = vor.u32 %v2570_v27, %v1866_v28 }
  0x27   :  { %345 = vmatpush.bf16.msra.mxu1 %v1885_v18  ;;  %358 = vmatpush.bf16.msra.mxu2 %v1889_v22  ;;  %v1873_v35 = vor.u32 %v2573_v31, %v1872_v29  ;;  %v1848_v36 = vld [vmem:[#allocation6 + $0x80] sm:$0xf]  ;;  %v2568_v37 = vld [vmem:[#allocation6 + $0x8c] sm:$0xf0]  ;;  %v2566_v38 = vld [vmem:[#allocation6 + $0x84] sm:$0xf]  ;;  %v1877_v39 = vor.u32 %v2571_v32, %v1874_v33 }
  0x28   :  { %371 = vmatpush.bf16.msra.mxu3 %v1893_v26  ;;  %v1850_v40 = vld [vmem:[#allocation6 + $0x90] sm:$0xf0]  ;;  %v1856_v41 = vld [vmem:[#allocation6 + $0x88] sm:$0xf]  ;;  %v2569_v42 = vld [vmem:[#allocation6 + $0x94] sm:$0xf0]  ;;  %v1849_v45 = vor.u32 %v2568_v37, %v1848_v36 }
  0x29   :  { %v2567_v43 = vld [vmem:[#allocation6 + $0x8c] sm:$0xf]  ;;  %v1858_v44 = vld [vmem:[#allocation6 + $0x98] sm:$0xf0]  ;;  %v1853_v46 = vor.u32 %v2566_v38, %v1850_v40  ;;  %v1857_v47 = vor.u32 %v2569_v42, %v1856_v41  ;;  %v1832_v48 = vld [vmem:[#allocation6 + $0x60] sm:$0xf] }
  0x2a   :  { %333 = vmatpush.bf16.msra.mxu0 %v1865_v30  ;;  %v2564_v49 = vld [vmem:[#allocation6 + $0x6c] sm:$0xf0]  ;;  %v2562_v50 = vld [vmem:[#allocation6 + $0x64] sm:$0xf]  ;;  %v1861_v51 = vor.u32 %v2567_v43, %v1858_v44  ;;  %v1834_v52 = vld [vmem:[#allocation6 + $0x70] sm:$0xf0] }
  0x2b   :  { %346 = vmatpush.bf16.msra.mxu1 %v1869_v34  ;;  %359 = vmatpush.bf16.msra.mxu2 %v1873_v35  ;;  %v1840_v53 = vld [vmem:[#allocation6 + $0x68] sm:$0xf]  ;;  %v2565_v54 = vld [vmem:[#allocation6 + $0x74] sm:$0xf0]  ;;  %v2563_v55 = vld [vmem:[#allocation6 + $0x6c] sm:$0xf]  ;;  %v1833_v57 = vor.u32 %v2564_v49, %v1832_v48  ;;  %v1837_v58 = vor.u32 %v2562_v50, %v1834_v52 }
  0x2c   :  { %372 = vmatpush.bf16.msra.mxu3 %v1877_v39  ;;  %v1842_v56 = vld [vmem:[#allocation6 + $0x78] sm:$0xf0]  ;;  %v1841_v59 = vor.u32 %v2565_v54, %v1840_v53  ;;  %v1816_v60 = vld [vmem:[#allocation6 + $0x40] sm:$0xf]  ;;  %v2560_v61 = vld [vmem:[#allocation6 + $0x4c] sm:$0xf0] }
  0x2d   :  { %v2558_v62 = vld [vmem:[#allocation6 + $0x44] sm:$0xf]  ;;  %v1845_v63 = vor.u32 %v2563_v55, %v1842_v56  ;;  %v1818_v0 = vld [vmem:[#allocation6 + $0x50] sm:$0xf0]  ;;  %v1824_v1 = vld [vmem:[#allocation6 + $0x48] sm:$0xf]  ;;  %v1817_v5 = vor.u32 %v2560_v61, %v1816_v60 }
  0x2e   :  { %334 = vmatpush.bf16.msra.mxu0 %v1849_v45  ;;  %v2561_v2 = vld [vmem:[#allocation6 + $0x54] sm:$0xf0]  ;;  %v2559_v3 = vld [vmem:[#allocation6 + $0x4c] sm:$0xf]  ;;  %v1826_v4 = vld [vmem:[#allocation6 + $0x58] sm:$0xf0]  ;;  %v1821_v7 = vor.u32 %v2558_v62, %v1818_v0 }
  0x2f   :  { %347 = vmatpush.bf16.msra.mxu1 %v1853_v46  ;;  %360 = vmatpush.bf16.msra.mxu2 %v1857_v47  ;;  %v1800_v6 = vld [vmem:[#allocation6 + $0x20] sm:$0xf]  ;;  %v1825_v8 = vor.u32 %v2561_v2, %v1824_v1  ;;  %v2556_v9 = vld [vmem:[#allocation6 + $0x2c] sm:$0xf0]  ;;  %v2554_v10 = vld [vmem:[#allocation6 + $0x24] sm:$0xf]  ;;  %v1829_v12 = vor.u32 %v2559_v3, %v1826_v4 }
  0x30   :  { %373 = vmatpush.bf16.msra.mxu3 %v1861_v51  ;;  %v1802_v11 = vld [vmem:[#allocation6 + $0x30] sm:$0xf0]  ;;  %v1808_v13 = vld [vmem:[#allocation6 + $0x28] sm:$0xf]  ;;  %v2557_v14 = vld [vmem:[#allocation6 + $0x34] sm:$0xf0]  ;;  %v1801_v18 = vor.u32 %v2556_v9, %v1800_v6 }
  0x31   :  { %v124_v15 = vld [vmem:[#allocation3] sm:$0xff]  ;;  %v2555_v16 = vld [vmem:[#allocation6 + $0x2c] sm:$0xf]  ;;  %v1784_v19 = vld [vmem:[#allocation6] sm:$0xf]  ;;  %v1805_v20 = vor.u32 %v2554_v10, %v1802_v11  ;;  %v1809_v21 = vor.u32 %v2557_v14, %v1808_v13 }
  0x32   :  { %335 = vmatpush.bf16.msra.mxu0 %v1833_v57  ;;  %v1810_v17 = vld [vmem:[#allocation6 + $0x38] sm:$0xf0]  ;;  %126 = vst.msk [vmem:[#allocation2] sm:$0xff] %vm125_vm0, %v124_v15  ;;  %v2552_v22 = vld [vmem:[#allocation6 + $0xc] sm:$0xf0] }
  0x33   :  { %348 = vmatpush.bf16.msra.mxu1 %v1837_v58  ;;  %361 = vmatpush.bf16.msra.mxu2 %v1841_v59  ;;  %v2550_v23 = vld [vmem:[#allocation6 + $0x4] sm:$0xf]  ;;  %v1786_v24 = vld [vmem:[#allocation6 + $0x10] sm:$0xf0]  ;;  %v1813_v25 = vor.u32 %v2555_v16, %v1810_v17  ;;  %v1792_v26 = vld [vmem:[#allocation6 + $0x8] sm:$0xf]  ;;  %v1785_v32 = vor.u32 %v2552_v22, %v1784_v19 }
  0x34   :  { %374 = vmatpush.bf16.msra.mxu3 %v1845_v63  ;;  %v2553_v27 = vld [vmem:[#allocation6 + $0x14] sm:$0xf0]  ;;  %v2551_v28 = vld [vmem:[#allocation6 + $0xc] sm:$0xf]  ;;  %v1794_v29 = vld [vmem:[#allocation6 + $0x18] sm:$0xf0]  ;;  %v1789_v35 = vor.u32 %v2550_v23, %v1786_v24 }
  0x35   :  { %v1996_v30 = vld [vmem:[#allocation9 + $0xa8] sm:$0xf]  ;;  %v2604_v31 = vld [vmem:[#allocation9 + $0xb0] sm:$0xf0]  ;;  %v1793_v36 = vor.u32 %v2553_v27, %v1792_v26  ;;  %v1984_v37 = vld [vmem:[#allocation9 + $0x90] sm:$0xf]  ;;  %v1797_v38 = vor.u32 %v2551_v28, %v1794_v29 }
  0x36   :  { %336 = vmatpush.bf16.msra.mxu0 %v1817_v5  ;;  %v2092_v33 = vld [vmem:[#allocation9 + $0x168] sm:$0xf]  ;;  %v2628_v34 = vld [vmem:[#allocation9 + $0x170] sm:$0xf0]  ;;  %v1997_v40 = vor.u32 %v2604_v31, %v1996_v30  ;;  %v2601_v45 = vld [vmem:[#allocation9 + $0x98] sm:$0xf0] }
  0x37   :  { %349 = vmatpush.bf16.msra.mxu1 %v1821_v7  ;;  %362 = vmatpush.bf16.msra.mxu2 %v1825_v8  ;;  %v2188_v41 = vld [vmem:[#allocation9 + $0x228] sm:$0xf]  ;;  %v2652_v42 = vld [vmem:[#allocation9 + $0x230] sm:$0xf0]  ;;  %v2093_v44 = vor.u32 %v2628_v34, %v2092_v33  ;;  %v2080_v48 = vld [vmem:[#allocation9 + $0x150] sm:$0xf]  ;;  %v1985_v51 = vor.u32 %v2601_v45, %v1984_v37 }
  0x38   :  { %375 = vmatpush.bf16.msra.mxu3 %v1829_v12  ;;  %v2284_v46 = vld [vmem:[#allocation9 + $0x2e8] sm:$0xf]  ;;  %v2676_v47 = vld [vmem:[#allocation9 + $0x2f0] sm:$0xf0]  ;;  %v2625_v49 = vld [vmem:[#allocation9 + $0x158] sm:$0xf0]  ;;  %v2189_v50 = vor.u32 %v2652_v42, %v2188_v41 }
  0x39   :  { %v127_v39 = vld [vmem:[#allocation2] sm:$0xff]  ;;  %v2285_v52 = vor.u32 %v2676_v47, %v2284_v46  ;;  %v1972_v53 = vld [vmem:[#allocation9 + $0x78] sm:$0xf]  ;;  %v2649_v55 = vld [vmem:[#allocation9 + $0x218] sm:$0xf0]  ;;  %v2081_v56 = vor.u32 %v2625_v49, %v2080_v48 }
  0x3a   :  { %337 = vmatpush.bf16.msra.mxu0 %v1801_v18  ;;  %v128_v43 = vpack.c.bf16 %v127_v39, %v127_v39  ;;  %v2176_v54 = vld [vmem:[#allocation9 + $0x210] sm:$0xf]  ;;  %v2598_v57 = vld [vmem:[#allocation9 + $0x80] sm:$0xf0]  ;;  %v2673_v59 = vld [vmem:[#allocation9 + $0x2d8] sm:$0xf0] }
  0x3b   :  { %350 = vmatpush.bf16.msra.mxu1 %v1805_v20  ;;  %363 = vmatpush.bf16.msra.mxu2 %v1809_v21  ;;  %v2272_v58 = vld [vmem:[#allocation9 + $0x2d0] sm:$0xf]  ;;  %v2068_v60 = vld [vmem:[#allocation9 + $0x138] sm:$0xf]  ;;  %v2622_v61 = vld [vmem:[#allocation9 + $0x140] sm:$0xf0]  ;;  %v2177_v62 = vor.u32 %v2649_v55, %v2176_v54  ;;  %v1973_v63 = vor.u32 %v2598_v57, %v1972_v53 }
  0x3c   :  { %376 = vmatpush.bf16.msra.mxu3 %v1813_v25  ;;  %v2273_v0 = vor.u32 %v2673_v59, %v2272_v58  ;;  %v1960_v1 = vld [vmem:[#allocation9 + $0x60] sm:$0xf]  ;;  %v2164_v2 = vld [vmem:[#allocation9 + $0x1f8] sm:$0xf]  ;;  %v2646_v3 = vld [vmem:[#allocation9 + $0x200] sm:$0xf0]  ;;  %v2069_v4 = vor.u32 %v2622_v61, %v2068_v60 }
  0x3d   :  { %v2595_v5 = vld [vmem:[#allocation9 + $0x68] sm:$0xf0]  ;;  %v2260_v6 = vld [vmem:[#allocation9 + $0x2b8] sm:$0xf]  ;;  %v2670_v7 = vld [vmem:[#allocation9 + $0x2c0] sm:$0xf0]  ;;  %v2165_v10 = vor.u32 %v2646_v3, %v2164_v2 }
  0x3e   :  { %338 = vmatpush.bf16.msra.mxu0 %v1785_v32  ;;  %v2056_v8 = vld [vmem:[#allocation9 + $0x120] sm:$0xf]  ;;  %v2619_v9 = vld [vmem:[#allocation9 + $0x128] sm:$0xf0]  ;;  %v1961_v11 = vor.u32 %v2595_v5, %v1960_v1  ;;  %v2261_v12 = vor.u32 %v2670_v7, %v2260_v6  ;;  %v1948_v13 = vld [vmem:[#allocation9 + $0x48] sm:$0xf] }
  0x3f   :  { %351 = vmatpush.bf16.msra.mxu1 %v1789_v35  ;;  %364 = vmatpush.bf16.msra.mxu2 %v1793_v36  ;;  %v2152_v14 = vld [vmem:[#allocation9 + $0x1e0] sm:$0xf]  ;;  %v2643_v15 = vld [vmem:[#allocation9 + $0x1e8] sm:$0xf0]  ;;  %v2057_v16 = vor.u32 %v2619_v9, %v2056_v8  ;;  %v2592_v17 = vld [vmem:[#allocation9 + $0x50] sm:$0xf0] }
  0x40   :  { %377 = vmatpush.bf16.msra.mxu3 %v1797_v38  ;;  %v2248_v18 = vld [vmem:[#allocation9 + $0x2a0] sm:$0xf]  ;;  %v2667_v19 = vld [vmem:[#allocation9 + $0x2a8] sm:$0xf0]  ;;  %v2044_v20 = vld [vmem:[#allocation9 + $0x108] sm:$0xf]  ;;  %v2153_v22 = vor.u32 %v2643_v15, %v2152_v14  ;;  %v1949_v23 = vor.u32 %v2592_v17, %v1948_v13 }
  0x41   :  { %339 = vmatmul.bf16.vlgmr.msra.gmra.mxu0 %v128_v43  ;;  %v2616_v21 = vld [vmem:[#allocation9 + $0x110] sm:$0xf0]  ;;  %v2249_v24 = vor.u32 %v2667_v19, %v2248_v18  ;;  %v1936_v25 = vld [vmem:[#allocation9 + $0x30] sm:$0xf]  ;;  %v2140_v26 = vld [vmem:[#allocation9 + $0x1c8] sm:$0xf] }
  0x42   :  { %1039 = vmatpush.bf16.msrb.mxu0 %v1997_v40  ;;  %352 = vmatmul.bf16.vlgmr.msra.gmra.mxu1 %v128_v43  ;;  %v2640_v27 = vld [vmem:[#allocation9 + $0x1d0] sm:$0xf0]  ;;  %v2045_v28 = vor.u32 %v2616_v21, %v2044_v20  ;;  %v2589_v29 = vld [vmem:[#allocation9 + $0x38] sm:$0xf0]  ;;  %v2236_v30 = vld [vmem:[#allocation9 + $0x288] sm:$0xf] }
  0x43   :  { %1052 = vmatpush.bf16.msrb.mxu1 %v2093_v44  ;;  %365 = vmatmul.bf16.vlgmr.msra.gmra.mxu2 %v128_v43  ;;  %v2664_v31 = vld [vmem:[#allocation9 + $0x290] sm:$0xf0]  ;;  %v2032_v32 = vld [vmem:[#allocation9 + $0xf0] sm:$0xf]  ;;  %v2613_v33 = vld [vmem:[#allocation9 + $0xf8] sm:$0xf0]  ;;  %v2141_v34 = vor.u32 %v2640_v27, %v2140_v26  ;;  %v1937_v35 = vor.u32 %v2589_v29, %v1936_v25 }
  0x44   :  { %378 = vmatmul.bf16.vlgmr.msra.gmra.mxu3 %v128_v43  ;;  %1065 = vmatpush.bf16.msrb.mxu2 %v2189_v50  ;;  %v2237_v36 = vor.u32 %v2664_v31, %v2236_v30  ;;  %v1924_v37 = vld [vmem:[#allocation9 + $0x18] sm:$0xf]  ;;  %v2128_v38 = vld [vmem:[#allocation9 + $0x1b0] sm:$0xf]  ;;  %v2637_v39 = vld [vmem:[#allocation9 + $0x1b8] sm:$0xf0]  ;;  %v2033_v40 = vor.u32 %v2613_v33, %v2032_v32 }
  0x45   :  { %1078 = vmatpush.bf16.msrb.mxu3 %v2285_v52  ;;  %v2586_v41 = vld [vmem:[#allocation9 + $0x20] sm:$0xf0]  ;;  %v2224_v42 = vld [vmem:[#allocation9 + $0x270] sm:$0xf]  ;;  %v2661_v43 = vld [vmem:[#allocation9 + $0x278] sm:$0xf0]  ;;  %v2129_v46 = vor.u32 %v2637_v39, %v2128_v38 }
  0x46   :  { %1040 = vmatpush.bf16.msrb.mxu0 %v1985_v51  ;;  %v2020_v44 = vld [vmem:[#allocation9 + $0xd8] sm:$0xf]  ;;  %v2610_v45 = vld [vmem:[#allocation9 + $0xe0] sm:$0xf0]  ;;  %v1912_v47 = vld [vmem:[#allocation9] sm:$0xf]  ;;  %v1925_v48 = vor.u32 %v2586_v41, %v1924_v37  ;;  %v2225_v49 = vor.u32 %v2661_v43, %v2224_v42 }
  0x47   :  { %1053 = vmatpush.bf16.msrb.mxu1 %v2081_v56  ;;  %v2583_v50 = vld [vmem:[#allocation9 + $0x8] sm:$0xf0]  ;;  %v2116_v51 = vld [vmem:[#allocation9 + $0x198] sm:$0xf]  ;;  %v2634_v52 = vld [vmem:[#allocation9 + $0x1a0] sm:$0xf0]  ;;  %v2021_v53 = vor.u32 %v2610_v45, %v2020_v44 }
  0x48   :  { %1066 = vmatpush.bf16.msrb.mxu2 %v2177_v62  ;;  %v2008_v54 = vld [vmem:[#allocation9 + $0xc0] sm:$0xf]  ;;  %v2212_v55 = vld [vmem:[#allocation9 + $0x258] sm:$0xf]  ;;  %v2658_v56 = vld [vmem:[#allocation9 + $0x260] sm:$0xf0]  ;;  %v2117_v62 = vor.u32 %v2634_v52, %v2116_v51 }
  0x49   :  { %1079 = vmatpush.bf16.msrb.mxu3 %v2273_v0  ;;  %v2607_v57 = vld [vmem:[#allocation9 + $0xc8] sm:$0xf0]  ;;  %v1998_v59 = vld [vmem:[#allocation9 + $0xb4] sm:$0xf0]  ;;  %v1913_v0 = vor.u32 %v2583_v50, %v1912_v47  ;;  %v2213_v1 = vor.u32 %v2658_v56, %v2212_v55  ;;  %v2600_v2 = vld [vmem:[#allocation9 + $0x94] sm:$0xf] }
  0x4a   :  { %1041 = vmatpush.bf16.msrb.mxu0 %v1973_v63  ;;  %v2603_v58 = vld [vmem:[#allocation9 + $0xac] sm:$0xf]  ;;  %v2094_v61 = vld [vmem:[#allocation9 + $0x174] sm:$0xf0]  ;;  %v2104_v63 = vld [vmem:[#allocation9 + $0x180] sm:$0xf]  ;;  %v2009_v5 = vor.u32 %v2607_v57, %v2008_v54 }
  0x4b   :  { %1054 = vmatpush.bf16.msrb.mxu1 %v2069_v4  ;;  %v2627_v60 = vld [vmem:[#allocation9 + $0x16c] sm:$0xf]  ;;  %v2200_v4 = vld [vmem:[#allocation9 + $0x240] sm:$0xf]  ;;  %v2001_v6 = vor.u32 %v2603_v58, %v1998_v59  ;;  %v2190_v9 = vld [vmem:[#allocation9 + $0x234] sm:$0xf0] }
  0x4c   :  { %1067 = vmatpush.bf16.msrb.mxu2 %v2165_v10  ;;  %v2631_v3 = vld [vmem:[#allocation9 + $0x188] sm:$0xf0]  ;;  %v2097_v10 = vor.u32 %v2627_v60, %v2094_v61  ;;  %v2286_v13 = vld [vmem:[#allocation9 + $0x2f4] sm:$0xf0]  ;;  %v2624_v14 = vld [vmem:[#allocation9 + $0x154] sm:$0xf] }
  0x4d   :  { %1080 = vmatpush.bf16.msrb.mxu3 %v2261_v12  ;;  %v2655_v7 = vld [vmem:[#allocation9 + $0x248] sm:$0xf0]  ;;  %v2082_v15 = vld [vmem:[#allocation9 + $0x15c] sm:$0xf0]  ;;  %v2597_v21 = vld [vmem:[#allocation9 + $0x7c] sm:$0xf] }
  0x4e   :  { %1042 = vmatpush.bf16.msrb.mxu0 %v1961_v11  ;;  %v2651_v8 = vld [vmem:[#allocation9 + $0x22c] sm:$0xf]  ;;  %v1986_v11 = vld [vmem:[#allocation9 + $0x9c] sm:$0xf0]  ;;  %v2201_v17 = vor.u32 %v2655_v7, %v2200_v4  ;;  %v1974_v25 = vld [vmem:[#allocation9 + $0x84] sm:$0xf0] }
  0x4f   :  { %1055 = vmatpush.bf16.msrb.mxu1 %v2057_v16  ;;  %v2675_v12 = vld [vmem:[#allocation9 + $0x2ec] sm:$0xf]  ;;  %v2105_v16 = vor.u32 %v2631_v3, %v2104_v63  ;;  %v2193_v18 = vor.u32 %v2651_v8, %v2190_v9  ;;  %v1989_v19 = vor.u32 %v2600_v2, %v1986_v11  ;;  %v2672_v26 = vld [vmem:[#allocation9 + $0x2d4] sm:$0xf]  ;;  %v2274_v27 = vld [vmem:[#allocation9 + $0x2dc] sm:$0xf0]  ;;  %v1977_v31 = vor.u32 %v2597_v21, %v1974_v25 }
  0x50   :  { %1068 = vmatpush.bf16.msrb.mxu2 %v2153_v22  ;;  %v2289_v20 = vor.u32 %v2675_v12, %v2286_v13  ;;  %v2648_v22 = vld [vmem:[#allocation9 + $0x214] sm:$0xf]  ;;  %v2070_v29 = vld [vmem:[#allocation9 + $0x144] sm:$0xf0]  ;;  %v2277_v32 = vor.u32 %v2672_v26, %v2274_v27  ;;  %v2594_v33 = vld [vmem:[#allocation9 + $0x64] sm:$0xf] }
  0x51   :  { %1081 = vmatpush.bf16.msrb.mxu3 %v2249_v24  ;;  %v2085_v24 = vor.u32 %v2624_v14, %v2082_v15  ;;  %v1962_v37 = vld [vmem:[#allocation9 + $0x6c] sm:$0xf0]  ;;  %v2669_v38 = vld [vmem:[#allocation9 + $0x2bc] sm:$0xf]  ;;  %v2262_v39 = vld [vmem:[#allocation9 + $0x2c4] sm:$0xf0] }
  0x52   :  { %1043 = vmatpush.bf16.msrb.mxu0 %v1949_v23  ;;  %v2178_v23 = vld [vmem:[#allocation9 + $0x21c] sm:$0xf0]  ;;  %v2058_v41 = vld [vmem:[#allocation9 + $0x12c] sm:$0xf0]  ;;  %v1965_v43 = vor.u32 %v2594_v33, %v1962_v37  ;;  %v2265_v44 = vor.u32 %v2669_v38, %v2262_v39  ;;  %v2591_v45 = vld [vmem:[#allocation9 + $0x4c] sm:$0xf] }
  0x53   :  { %1056 = vmatpush.bf16.msrb.mxu1 %v2045_v28  ;;  %v2621_v28 = vld [vmem:[#allocation9 + $0x13c] sm:$0xf]  ;;  %v2181_v30 = vor.u32 %v2648_v22, %v2178_v23  ;;  %v2154_v47 = vld [vmem:[#allocation9 + $0x1ec] sm:$0xf0]  ;;  %v2666_v50 = vld [vmem:[#allocation9 + $0x2a4] sm:$0xf] }
  0x54   :  { %1069 = vmatpush.bf16.msrb.mxu2 %v2141_v34  ;;  %v2645_v34 = vld [vmem:[#allocation9 + $0x1fc] sm:$0xf]  ;;  %v2250_v51 = vld [vmem:[#allocation9 + $0x2ac] sm:$0xf0]  ;;  %v2615_v52 = vld [vmem:[#allocation9 + $0x10c] sm:$0xf] }
  0x55   :  { %1082 = vmatpush.bf16.msrb.mxu3 %v2237_v36  ;;  %v2073_v36 = vor.u32 %v2621_v28, %v2070_v29  ;;  %v2253_v56 = vor.u32 %v2666_v50, %v2250_v51  ;;  %v2588_v58 = vld [vmem:[#allocation9 + $0x34] sm:$0xf]  ;;  %v1938_v59 = vld [vmem:[#allocation9 + $0x3c] sm:$0xf0]  ;;  %v2663_v2 = vld [vmem:[#allocation9 + $0x28c] sm:$0xf] }
  0x56   :  { %1044 = vmatpush.bf16.msrb.mxu0 %v1937_v35  ;;  %v2166_v35 = vld [vmem:[#allocation9 + $0x204] sm:$0xf0]  ;;  %v2612_v60 = vld [vmem:[#allocation9 + $0xf4] sm:$0xf]  ;;  %v2034_v61 = vld [vmem:[#allocation9 + $0xfc] sm:$0xf0] }
  0x57   :  { %1057 = vmatpush.bf16.msrb.mxu1 %v2033_v40  ;;  %v2618_v40 = vld [vmem:[#allocation9 + $0x124] sm:$0xf]  ;;  %v2169_v42 = vor.u32 %v2645_v34, %v2166_v35  ;;  %v2037_v63 = vor.u32 %v2612_v60, %v2034_v61  ;;  %v2238_v4 = vld [vmem:[#allocation9 + $0x294] sm:$0xf0]  ;;  %v1926_v7 = vld [vmem:[#allocation9 + $0x24] sm:$0xf0] }
  0x58   :  { %1070 = vmatpush.bf16.msrb.mxu2 %v2129_v46  ;;  %v2642_v46 = vld [vmem:[#allocation9 + $0x1e4] sm:$0xf]  ;;  %v2609_v8 = vld [vmem:[#allocation9 + $0xdc] sm:$0xf]  ;;  %v2636_v12 = vld [vmem:[#allocation9 + $0x1b4] sm:$0xf] }
  0x59   :  { %1083 = vmatpush.bf16.msrb.mxu3 %v2225_v49  ;;  %v1950_v49 = vld [vmem:[#allocation9 + $0x54] sm:$0xf0]  ;;  %v2157_v54 = vor.u32 %v2642_v46, %v2154_v47  ;;  %v2130_v13 = vld [vmem:[#allocation9 + $0x1bc] sm:$0xf0]  ;;  %v2660_v14 = vld [vmem:[#allocation9 + $0x274] sm:$0xf] }
  0x5a   :  { %1045 = vmatpush.bf16.msrb.mxu0 %v1925_v48  ;;  %v2061_v48 = vor.u32 %v2618_v40, %v2058_v41  ;;  %v1953_v55 = vor.u32 %v2591_v45, %v1950_v49  ;;  %v2133_v15 = vor.u32 %v2636_v12, %v2130_v13  ;;  %v2606_v21 = vld [vmem:[#allocation9 + $0xc4] sm:$0xf]  ;;  %v2010_v22 = vld [vmem:[#allocation9 + $0xcc] sm:$0xf0]  ;;  %v2118_v25 = vld [vmem:[#allocation9 + $0x1a4] sm:$0xf0] }
  0x5b   :  { %1058 = vmatpush.bf16.msrb.mxu1 %v2021_v53  ;;  %v2046_v53 = vld [vmem:[#allocation9 + $0x114] sm:$0xf0]  ;;  %v2013_v23 = vor.u32 %v2606_v21, %v2010_v22  ;;  %v2657_v27 = vld [vmem:[#allocation9 + $0x25c] sm:$0xf]  ;;  %v2214_v28 = vld [vmem:[#allocation9 + $0x264] sm:$0xf0] }
  0x5c   :  { %1071 = vmatpush.bf16.msrb.mxu2 %v2117_v62  ;;  %v2049_v57 = vor.u32 %v2615_v52, %v2046_v53  ;;  %v1941_v62 = vor.u32 %v2588_v58, %v1938_v59  ;;  %v2217_v29 = vor.u32 %v2657_v27, %v2214_v28  ;;  %v2654_v33 = vld [vmem:[#allocation9 + $0x244] sm:$0xf]  ;;  %v2202_v34 = vld [vmem:[#allocation9 + $0x24c] sm:$0xf0]  ;;  %v2629_v46 = vld [vmem:[#allocation9 + $0x178] sm:$0xf0] }
  0x5d   :  { %1084 = vmatpush.bf16.msrb.mxu3 %v2213_v1  ;;  %v2142_v1 = vld [vmem:[#allocation9 + $0x1d4] sm:$0xf0]  ;;  %v2205_v35 = vor.u32 %v2654_v33, %v2202_v34  ;;  %v2100_v45 = vld [vmem:[#allocation9 + $0x170] sm:$0xf]  ;;  %v2626_v58 = vld [vmem:[#allocation9 + $0x160] sm:$0xf0] }
  0x5e   :  { %1046 = vmatpush.bf16.msrb.mxu0 %v1913_v0  ;;  %v2639_v0 = vld [vmem:[#allocation9 + $0x1cc] sm:$0xf]  ;;  %v2101_v53 = vor.u32 %v2629_v46, %v2100_v45  ;;  %v2674_v22 = vld [vmem:[#allocation9 + $0x2e0] sm:$0xf0] }
  0x5f   :  { %1059 = vmatpush.bf16.msrb.mxu1 %v2009_v5  ;;  %v2145_v3 = vor.u32 %v2639_v0, %v2142_v1  ;;  %v2241_v5 = vor.u32 %v2663_v2, %v2238_v4  ;;  %v2196_v0 = vld [vmem:[#allocation9 + $0x230] sm:$0xf]  ;;  %v2653_v1 = vld [vmem:[#allocation9 + $0x238] sm:$0xf0]  ;;  %v2647_v33 = vld [vmem:[#allocation9 + $0x208] sm:$0xf0] }
  0x60   :  { %1072 = vmatpush.bf16.msrb.mxu2 %v2105_v16  ;;  %v2226_v16 = vld [vmem:[#allocation9 + $0x27c] sm:$0xf0]  ;;  %v2292_v2 = vld [vmem:[#allocation9 + $0x2f0] sm:$0xf]  ;;  %v2197_v13 = vor.u32 %v2653_v1, %v2196_v0  ;;  %v2587_v0 = vld [vmem:[#allocation9 + $0x28] sm:$0xf0] }
  0x61   :  { %1085 = vmatpush.bf16.msrb.mxu3 %v2201_v17  ;;  %v2229_v17 = vor.u32 %v2660_v14, %v2226_v16  ;;  %v2028_v1 = vld [vmem:[#allocation9 + $0xe0] sm:$0xf] }
  0x62   :  { %1091 = vmatpush.bf16.msra.mxu0 %v2001_v6  ;;  %v2585_v6 = vld [vmem:[#allocation9 + $0x1c] sm:$0xf] }
  0x63   :  { %1104 = vmatpush.bf16.msra.mxu1 %v2097_v10  ;;  %v1929_v9 = vor.u32 %v2585_v6, %v1926_v7  ;;  %v2022_v10 = vld [vmem:[#allocation9 + $0xe4] sm:$0xf0]  ;;  %v2677_v6 = vld [vmem:[#allocation9 + $0x2f8] sm:$0xf0]  ;;  %v1980_v7 = vld [vmem:[#allocation9 + $0x80] sm:$0xf] }
  0x64   :  { %1117 = vmatpush.bf16.msra.mxu2 %v2193_v18  ;;  %v2025_v11 = vor.u32 %v2609_v8, %v2022_v10  ;;  %v2582_v18 = vld [vmem:[#allocation9 + $0x4] sm:$0xf]  ;;  %v2599_v8 = vld [vmem:[#allocation9 + $0x88] sm:$0xf0]  ;;  %v2076_v10 = vld [vmem:[#allocation9 + $0x140] sm:$0xf] }
  0x65   :  { %1130 = vmatpush.bf16.msra.mxu3 %v2289_v20  ;;  %v1981_v16 = vor.u32 %v2599_v8, %v1980_v7  ;;  %v2232_v7 = vld [vmem:[#allocation9 + $0x278] sm:$0xf] }
  0x66   :  { %1092 = vmatpush.bf16.msra.mxu0 %v1989_v19  ;;  %v1914_v19 = vld [vmem:[#allocation9 + $0xc] sm:$0xf0] }
  0x67   :  { %1105 = vmatpush.bf16.msra.mxu1 %v2085_v24  ;;  %v1917_v20 = vor.u32 %v2582_v18, %v1914_v19  ;;  %v2633_v24 = vld [vmem:[#allocation9 + $0x19c] sm:$0xf]  ;;  %v2650_v18 = vld [vmem:[#allocation9 + $0x220] sm:$0xf0]  ;;  %v2280_v19 = vld [vmem:[#allocation9 + $0x2d8] sm:$0xf] }
  0x68   :  { %1118 = vmatpush.bf16.msra.mxu2 %v2181_v30  ;;  %v2121_v26 = vor.u32 %v2633_v24, %v2118_v25  ;;  %v2630_v30 = vld [vmem:[#allocation9 + $0x184] sm:$0xf]  ;;  %v2596_v24 = vld [vmem:[#allocation9 + $0x70] sm:$0xf0]  ;;  %v2064_v25 = vld [vmem:[#allocation9 + $0x128] sm:$0xf] }
  0x69   :  { %1131 = vmatpush.bf16.msra.mxu3 %v2277_v32 }
  0x6a   :  { %1093 = vmatpush.bf16.msra.mxu0 %v1977_v31  ;;  %v2106_v31 = vld [vmem:[#allocation9 + $0x18c] sm:$0xf0] }
  0x6b   :  { %1106 = vmatpush.bf16.msra.mxu1 %v2073_v36  ;;  %v2109_v32 = vor.u32 %v2630_v30, %v2106_v31  ;;  %v161_v36 = vld [vmem:[#allocation8] sm:$0xf]  ;;  %v2281_v30 = vor.u32 %v2674_v22, %v2280_v19  ;;  %v2416_v19 = vld [vmem:[#allocation11 + $0xf0] sm:$0xf] }
  0x6c   :  { %1119 = vmatpush.bf16.msra.mxu2 %v2169_v42  ;;  %v163_v37 = vperm.slane %v161_v36, 0  ;;  %v164_v38 = vperm.slane %v161_v36, 1  ;;  %v2004_v42 = vld [vmem:[#allocation9 + $0xb0] sm:$0xf]  ;;  %v165_v49 = vperm.slane %v161_v36, 2  ;;  %v166_v52 = vperm.slane %v161_v36, 3 }
  0x6d   :  { %1132 = vmatpush.bf16.msra.mxu3 %v2265_v44  ;;  %v2671_v36 = vld [vmem:[#allocation9 + $0x2c8] sm:$0xf0] }
  0x6e   :  { %1094 = vmatpush.bf16.msra.mxu0 %v1965_v43  ;;  %v2605_v43 = vld [vmem:[#allocation9 + $0xb8] sm:$0xf0] }
  0x6f   :  { %1107 = vmatpush.bf16.msra.mxu1 %v2061_v48  ;;  %v2005_v50 = vor.u32 %v2605_v43, %v2004_v42  ;;  %v2160_v43 = vld [vmem:[#allocation9 + $0x1e8] sm:$0xf] }
  0x70   :  { %1120 = vmatpush.bf16.msra.mxu2 %v2157_v54  ;;  %v1992_v54 = vld [vmem:[#allocation9 + $0x98] sm:$0xf] }
  0x71   :  { %1133 = vmatpush.bf16.msra.mxu3 %v2253_v56 }
  0x72   :  { %1095 = vmatpush.bf16.msra.mxu0 %v1953_v55  ;;  %v2602_v55 = vld [vmem:[#allocation9 + $0xa0] sm:$0xf0] }
  0x73   :  { %1108 = vmatpush.bf16.msra.mxu1 %v2049_v57  ;;  %v2088_v57 = vld [vmem:[#allocation9 + $0x158] sm:$0xf] }
  0x74   :  { %1121 = vmatpush.bf16.msra.mxu2 %v2145_v3 }
  0x75   :  { %1134 = vmatpush.bf16.msra.mxu3 %v2241_v5  ;;  %v2089_v5 = vor.u32 %v2626_v58, %v2088_v57  ;;  %v2148_v57 = vld [vmem:[#allocation9 + $0x1d0] sm:$0xf]  ;;  %v2641_v58 = vld [vmem:[#allocation9 + $0x1d8] sm:$0xf0] }
  0x76   :  { %1096 = vmatpush.bf16.msra.mxu0 %v1941_v62 }
  0x77   :  { %1109 = vmatpush.bf16.msra.mxu1 %v2037_v63  ;;  %v1993_v63 = vor.u32 %v2602_v55, %v1992_v54 }
  0x78   :  { %1122 = vmatpush.bf16.msra.mxu2 %v2133_v15  ;;  %v2293_v15 = vor.u32 %v2677_v6, %v2292_v2  ;;  %v2611_v2 = vld [vmem:[#allocation9 + $0xe8] sm:$0xf0]  ;;  %v2638_v6 = vld [vmem:[#allocation9 + $0x1c0] sm:$0xf0] }
  0x79   :  { %1135 = vmatpush.bf16.msra.mxu3 %v2229_v17  ;;  %v2184_v17 = vld [vmem:[#allocation9 + $0x218] sm:$0xf] }
  0x7a   :  { %1097 = vmatpush.bf16.msra.mxu0 %v1929_v9  ;;  %v2185_v28 = vor.u32 %v2650_v18, %v2184_v17  ;;  %v2693_v18 = vld [vmem:[#allocation11 + $0x74] sm:$0xf0] }
  0x7b   :  { %1110 = vmatpush.bf16.msra.mxu1 %v2025_v11  ;;  %v2623_v11 = vld [vmem:[#allocation9 + $0x148] sm:$0xf0] }
  0x7c   :  { %1123 = vmatpush.bf16.msra.mxu2 %v2121_v26  ;;  %v2077_v21 = vor.u32 %v2623_v11, %v2076_v10  ;;  %v2620_v26 = vld [vmem:[#allocation9 + $0x130] sm:$0xf0]  ;;  %v2662_v10 = vld [vmem:[#allocation9 + $0x280] sm:$0xf0]  ;;  %v1920_v11 = vld [vmem:[#allocation9 + $0x8] sm:$0xf] }
  0x7d   :  { %1136 = vmatpush.bf16.msra.mxu3 %v2217_v29  ;;  %v2065_v34 = vor.u32 %v2620_v26, %v2064_v25  ;;  %v2233_v22 = vor.u32 %v2662_v10, %v2232_v7  ;;  %v2330_v7 = vld [vmem:[#allocation11 + $0x48] sm:$0xf0]  ;;  %v2679_v10 = vld [vmem:[#allocation11 + $0x4] sm:$0xf0] }
  0x7e   :  { %1098 = vmatpush.bf16.msra.mxu0 %v1917_v20 }
  0x7f   :  { %1111 = vmatpush.bf16.msra.mxu1 %v2013_v23  ;;  %v1968_v23 = vld [vmem:[#allocation9 + $0x68] sm:$0xf] }
  0x80   :  { %1124 = vmatpush.bf16.msra.mxu2 %v2109_v32  ;;  %v1969_v31 = vor.u32 %v2596_v24, %v1968_v23  ;;  %v2172_v32 = vld [vmem:[#allocation9 + $0x200] sm:$0xf]  ;;  %v2635_v24 = vld [vmem:[#allocation9 + $0x1a8] sm:$0xf0] }
  0x81   :  { %1137 = vmatpush.bf16.msra.mxu3 %v2205_v35  ;;  %v2268_v35 = vld [vmem:[#allocation9 + $0x2c0] sm:$0xf] }
  0x82   :  { %v2269_v42 = vor.u32 %v2671_v36, %v2268_v35  ;;  %v2124_v23 = vld [vmem:[#allocation9 + $0x1a0] sm:$0xf]  ;;  %v2707_v35 = vld [vmem:[#allocation11 + $0xe4] sm:$0xf0] }
  0xbe   :  { %v340_v39 = vpop.f32.mrf.mxu0 }
  0xbf   :  { %v341_v40 = vadd.f32 %v340_v39, %v163_v37  ;;  %v353_v41 = vpop.f32.mrf.mxu1  ;;  %v1956_v37 = vld [vmem:[#allocation9 + $0x50] sm:$0xf] }
  0xc0   :  { %v354_v44 = vadd.f32 %v353_v41, %v164_v38  ;;  %v2593_v38 = vld [vmem:[#allocation9 + $0x58] sm:$0xf0]  ;;  %v2052_v39 = vld [vmem:[#allocation9 + $0x110] sm:$0xf]  ;;  %v2173_v41 = vor.u32 %v2647_v33, %v2172_v32  ;;  %v2125_v32 = vor.u32 %v2635_v24, %v2124_v23  ;;  %v2691_v33 = vld [vmem:[#allocation11 + $0x64] sm:$0xf0] }
  0xc1   :  { %v383_v47 = vmax.f32 %v341_v40, 0.0  ;;  %v2617_v40 = vld [vmem:[#allocation9 + $0x118] sm:$0xf0]  ;;  %v1957_v45 = vor.u32 %v2593_v38, %v1956_v37  ;;  %v2112_v37 = vld [vmem:[#allocation9 + $0x188] sm:$0xf] }
  0xc2   :  { %v384_v48 = vmax.f32 %v354_v44, 0.0  ;;  %v2644_v44 = vld [vmem:[#allocation9 + $0x1f0] sm:$0xf0]  ;;  %v2053_v46 = vor.u32 %v2617_v40, %v2052_v39  ;;  %v2208_v39 = vld [vmem:[#allocation9 + $0x248] sm:$0xf] }
  0xc3   :  { %v3027_v51 = vpack.c.bf16 %v383_v47, %v383_v47  ;;  %v2256_v47 = vld [vmem:[#allocation9 + $0x2a8] sm:$0xf]  ;;  %v2161_v54 = vor.u32 %v2644_v44, %v2160_v43  ;;  %v2632_v38 = vld [vmem:[#allocation9 + $0x190] sm:$0xf0]  ;;  %v2354_v43 = vld [vmem:[#allocation11 + $0x78] sm:$0xf0] }
  0xc4   :  { %v3029_v56 = vpack.c.bf16 %v384_v48, %v384_v48  ;;  %v2668_v48 = vld [vmem:[#allocation9 + $0x2b0] sm:$0xf0]  ;;  %v2384_v23 = vld [vmem:[#allocation11 + $0xb0] sm:$0xf]  ;;  %v2701_v24 = vld [vmem:[#allocation11 + $0xb4] sm:$0xf0] }
  0xc5   :  { %1047 = vmatmul.bf16.vlgmr.msrb.gmra.mxu0 %v3027_v51  ;;  %v2257_v55 = vor.u32 %v2668_v48, %v2256_v47  ;;  %v2656_v40 = vld [vmem:[#allocation9 + $0x250] sm:$0xf0]  ;;  %v2689_v47 = vld [vmem:[#allocation11 + $0x54] sm:$0xf0] }
  0xc6   :  { %v366_v59 = vpop.f32.mrf.mxu2  ;;  %1060 = vmatmul.bf16.vlgmr.msrb.gmra.mxu1 %v3029_v56  ;;  %v342_v62 = vpop.f32.mrf.mxu0  ;;  %1143 = vmatpush.bf16.msrb.mxu0 %v2005_v50  ;;  %v2590_v50 = vld [vmem:[#allocation9 + $0x40] sm:$0xf0]  ;;  %v2209_v48 = vor.u32 %v2656_v40, %v2208_v39  ;;  %v2402_v39 = vld [vmem:[#allocation11 + $0xd8] sm:$0xf0] }
  0xc7   :  { %v367_v60 = vadd.f32 %v366_v59, %v165_v49  ;;  %v379_v61 = vpop.f32.mrf.mxu3  ;;  %1156 = vmatpush.bf16.msrb.mxu1 %v2101_v53  ;;  %v355_v4 = vpop.f32.mrf.mxu1  ;;  %v1944_v49 = vld [vmem:[#allocation9 + $0x38] sm:$0xf]  ;;  %v2614_v53 = vld [vmem:[#allocation9 + $0x100] sm:$0xf0]  ;;  %v2665_v62 = vld [vmem:[#allocation9 + $0x298] sm:$0xf0] }
  0xc8   :  { %v380_v3 = vadd.f32 %v379_v61, %v166_v52  ;;  %v2040_v52 = vld [vmem:[#allocation9 + $0xf8] sm:$0xf]  ;;  %v1945_v59 = vor.u32 %v2590_v50, %v1944_v49  ;;  %v2244_v61 = vld [vmem:[#allocation9 + $0x290] sm:$0xf] }
  0xc9   :  { %v385_v9 = vmax.f32 %v367_v60, 0.0  ;;  %v2041_v60 = vor.u32 %v2614_v53, %v2040_v52  ;;  %v2245_v4 = vor.u32 %v2665_v62, %v2244_v61  ;;  %v2690_v52 = vld [vmem:[#allocation11 + $0x64] sm:$0xf]  ;;  %v2346_v53 = vld [vmem:[#allocation11 + $0x68] sm:$0xf0] }
  0xca   :  { %v386_v12 = vmax.f32 %v380_v3, 0.0  ;;  %1144 = vmatpush.bf16.msrb.mxu0 %v1993_v63  ;;  %v1932_v63 = vld [vmem:[#allocation9 + $0x20] sm:$0xf]  ;;  %v2149_v3 = vor.u32 %v2641_v58, %v2148_v57  ;;  %v2349_v57 = vor.u32 %v2690_v52, %v2346_v53  ;;  %v2695_v52 = vld [vmem:[#allocation11 + $0x84] sm:$0xf0] }
  0xcb   :  { %v3033_v14 = vpack.c.bf16 %v385_v9, %v385_v9  ;;  %1157 = vmatpush.bf16.msrb.mxu1 %v2089_v5  ;;  %v2136_v5 = vld [vmem:[#allocation9 + $0x1b8] sm:$0xf]  ;;  %v1933_v8 = vor.u32 %v2587_v0, %v1932_v63  ;;  %v2029_v9 = vor.u32 %v2611_v2, %v2028_v1  ;;  %v2312_v63 = vld [vmem:[#allocation11 + $0x20] sm:$0xf]  ;;  %v2683_v0 = vld [vmem:[#allocation11 + $0x24] sm:$0xf0] }
  0xcc   :  { %v3035_v20 = vpack.c.bf16 %v386_v12, %v386_v12  ;;  %v2584_v12 = vld [vmem:[#allocation9 + $0x10] sm:$0xf0]  ;;  %v2137_v17 = vor.u32 %v2638_v6, %v2136_v5  ;;  %v2313_v1 = vor.u32 %v2683_v0, %v2312_v63  ;;  %v2304_v2 = vld [vmem:[#allocation11 + $0x10] sm:$0xf]  ;;  %v2705_v5 = vld [vmem:[#allocation11 + $0xd4] sm:$0xf0] }
  0xcd   :  { %1073 = vmatmul.bf16.vlgmr.msrb.gmra.mxu2 %v3033_v14  ;;  %v1921_v25 = vor.u32 %v2584_v12, %v1920_v11  ;;  %v2686_v6 = vld [vmem:[#allocation11 + $0x44] sm:$0xf]  ;;  %v2392_v11 = vld [vmem:[#allocation11 + $0xc0] sm:$0xf]  ;;  %v2723_v63 = vld [vmem:[#allocation11 + $0x164] sm:$0xf0] }
  0xce   :  { %1086 = vmatmul.bf16.vlgmr.msrb.gmra.mxu3 %v3035_v20  ;;  %v368_v27 = vpop.f32.mrf.mxu2  ;;  %1169 = vmatpush.bf16.msrb.mxu2 %v2197_v13  ;;  %v2016_v13 = vld [vmem:[#allocation9 + $0xc8] sm:$0xf]  ;;  %v2698_v0 = vld [vmem:[#allocation11 + $0xa4] sm:$0xf] }
  0xcf   :  { %v381_v29 = vpop.f32.mrf.mxu3  ;;  %1182 = vmatpush.bf16.msrb.mxu3 %v2293_v15  ;;  %1145 = vmatpush.bf16.msrb.mxu0 %v1981_v16  ;;  %v2608_v15 = vld [vmem:[#allocation9 + $0xd0] sm:$0xf0]  ;;  %v2352_v16 = vld [vmem:[#allocation11 + $0x70] sm:$0xf]  ;;  %v2220_v27 = vld [vmem:[#allocation9 + $0x260] sm:$0xf] }
  0xd0   :  { %1158 = vmatpush.bf16.msrb.mxu1 %v2077_v21  ;;  %v2709_v21 = vld [vmem:[#allocation11 + $0xf4] sm:$0xf0]  ;;  %v2017_v26 = vor.u32 %v2608_v15, %v2016_v13  ;;  %v2353_v29 = vor.u32 %v2693_v18, %v2352_v16  ;;  %v2703_v13 = vld [vmem:[#allocation11 + $0xc4] sm:$0xf0]  ;;  %v2684_v15 = vld [vmem:[#allocation11 + $0x34] sm:$0xf] }
  0xd1   :  { %v2322_v16 = vld [vmem:[#allocation11 + $0x38] sm:$0xf0] }
  0xd2   :  { %1170 = vmatpush.bf16.msrb.mxu2 %v2185_v28  ;;  %v2659_v28 = vld [vmem:[#allocation9 + $0x268] sm:$0xf0]  ;;  %v2325_v18 = vor.u32 %v2684_v15, %v2322_v16 }
  0xd3   :  { %1183 = vmatpush.bf16.msrb.mxu3 %v2281_v30  ;;  %1146 = vmatpush.bf16.msrb.mxu0 %v1969_v31  ;;  %v2344_v30 = vld [vmem:[#allocation11 + $0x60] sm:$0xf]  ;;  %v2417_v31 = vor.u32 %v2709_v21, %v2416_v19  ;;  %v2221_v36 = vor.u32 %v2659_v28, %v2220_v27  ;;  %v2708_v19 = vld [vmem:[#allocation11 + $0xf4] sm:$0xf]  ;;  %v2418_v21 = vld [vmem:[#allocation11 + $0xf8] sm:$0xf0] }
  0xd4   :  { %1159 = vmatpush.bf16.msrb.mxu1 %v2065_v34  ;;  %v2408_v34 = vld [vmem:[#allocation11 + $0xe0] sm:$0xf]  ;;  %v2314_v27 = vld [vmem:[#allocation11 + $0x28] sm:$0xf0]  ;;  %v2706_v28 = vld [vmem:[#allocation11 + $0xe4] sm:$0xf] }
  0xd5   :  { %1099 = vmatmul.bf16.vlgmr.msra.gmra.mxu0 %v3027_v51  ;;  %v2409_v44 = vor.u32 %v2707_v35, %v2408_v34  ;;  %v2680_v35 = vld [vmem:[#allocation11 + $0x14] sm:$0xf] }
  0xd6   :  { %1171 = vmatpush.bf16.msrb.mxu2 %v2173_v41  ;;  %1112 = vmatmul.bf16.vlgmr.msra.gmra.mxu1 %v3029_v56  ;;  %v2345_v41 = vor.u32 %v2691_v33, %v2344_v30  ;;  %v2410_v30 = vld [vmem:[#allocation11 + $0xe8] sm:$0xf0]  ;;  %v2699_v33 = vld [vmem:[#allocation11 + $0xa4] sm:$0xf0] }
  0xd7   :  { %1184 = vmatpush.bf16.msrb.mxu3 %v2269_v42  ;;  %1147 = vmatpush.bf16.msrb.mxu0 %v1957_v45  ;;  %v2692_v42 = vld [vmem:[#allocation11 + $0x74] sm:$0xf]  ;;  %v2113_v45 = vor.u32 %v2632_v38, %v2112_v37 }
  0xd8   :  { %1160 = vmatpush.bf16.msrb.mxu1 %v2053_v46  ;;  %v2336_v46 = vld [vmem:[#allocation11 + $0x50] sm:$0xf]  ;;  %v2357_v49 = vor.u32 %v2692_v42, %v2354_v43  ;;  %v2704_v37 = vld [vmem:[#allocation11 + $0xd4] sm:$0xf]  ;;  %v2697_v42 = vld [vmem:[#allocation11 + $0x94] sm:$0xf0] }
  0xd9   :  { %v2337_v50 = vor.u32 %v2689_v47, %v2336_v46  ;;  %v2405_v40 = vor.u32 %v2704_v37, %v2402_v39  ;;  %v2702_v47 = vld [vmem:[#allocation11 + $0xc4] sm:$0xf]  ;;  %v2715_v39 = vld [vmem:[#allocation11 + $0x124] sm:$0xf0] }
  0xda   :  { %1172 = vmatpush.bf16.msrb.mxu2 %v2161_v54  ;;  %v2328_v54 = vld [vmem:[#allocation11 + $0x40] sm:$0xf] }
  0xdb   :  { %1185 = vmatpush.bf16.msrb.mxu3 %v2257_v55  ;;  %1148 = vmatpush.bf16.msrb.mxu0 %v1945_v59  ;;  %v2687_v55 = vld [vmem:[#allocation11 + $0x44] sm:$0xf0]  ;;  %v2338_v59 = vld [vmem:[#allocation11 + $0x58] sm:$0xf0] }
  0xdc   :  { %1161 = vmatpush.bf16.msrb.mxu1 %v2041_v60  ;;  %v2329_v58 = vor.u32 %v2687_v55, %v2328_v54  ;;  %v2685_v60 = vld [vmem:[#allocation11 + $0x34] sm:$0xf0]  ;;  %v2480_v54 = vld [vmem:[#allocation11 + $0x170] sm:$0xf] }
  0xdd   :  { %1125 = vmatmul.bf16.vlgmr.msra.gmra.mxu2 %v3033_v14  ;;  %v2725_v55 = vld [vmem:[#allocation11 + $0x174] sm:$0xf0] }
  0xde   :  { %1138 = vmatmul.bf16.vlgmr.msra.gmra.mxu3 %v3035_v20  ;;  %1173 = vmatpush.bf16.msrb.mxu2 %v2149_v3  ;;  %v2400_v3 = vld [vmem:[#allocation11 + $0xd0] sm:$0xf] }
  0xdf   :  { %1186 = vmatpush.bf16.msrb.mxu3 %v2245_v4  ;;  %1149 = vmatpush.bf16.msrb.mxu0 %v1933_v8  ;;  %v2333_v8 = vor.u32 %v2686_v6, %v2330_v7  ;;  %v3050_v6 = vld [vmem:[%s3068_s4] sm:$0x7]  ;;  %v2464_v7 = vld [vmem:[#allocation11 + $0x150] sm:$0xf] }
  0xe0   :  { %1162 = vmatpush.bf16.msrb.mxu1 %v2029_v9  ;;  %v2296_v9 = vld [vmem:[#allocation11] sm:$0xf] }
  0xe1   :  { %v2297_v12 = vor.u32 %v2679_v10, %v2296_v9  ;;  %v2370_v10 = vld [vmem:[#allocation11 + $0x98] sm:$0xf0] }
  0xe2   :  { %1174 = vmatpush.bf16.msrb.mxu2 %v2137_v17  ;;  %v2393_v17 = vor.u32 %v2703_v13, %v2392_v11  ;;  %v2720_v11 = vld [vmem:[#allocation11 + $0x154] sm:$0xf] }
  0xe3   :  { %1187 = vmatpush.bf16.msrb.mxu3 %v2233_v22  ;;  %1150 = vmatpush.bf16.msrb.mxu0 %v1921_v25  ;;  %v2421_v22 = vor.u32 %v2708_v19, %v2418_v21  ;;  %v2385_v25 = vor.u32 %v2701_v24, %v2384_v23  ;;  %v2456_v19 = vld [vmem:[#allocation11 + $0x140] sm:$0xf]  ;;  %v2719_v21 = vld [vmem:[#allocation11 + $0x144] sm:$0xf0]  ;;  %v2694_v23 = vld [vmem:[#allocation11 + $0x84] sm:$0xf] }
  0xe4   :  { %1163 = vmatpush.bf16.msrb.mxu1 %v2017_v26  ;;  %v2682_v26 = vld [vmem:[#allocation11 + $0x24] sm:$0xf]  ;;  %v2362_v24 = vld [vmem:[#allocation11 + $0x88] sm:$0xf0] }
  0xe6   :  { %1175 = vmatpush.bf16.msrb.mxu2 %v2125_v32  ;;  %1151 = vmatmul.bf16.vlgmr.msrb.gmra.mxu0 %v3027_v51  ;;  %v2688_v51 = vld [vmem:[#allocation11 + $0x54] sm:$0xf]  ;;  %v2376_v32 = vld [vmem:[#allocation11 + $0xa0] sm:$0xf] }
  0xe7   :  { %1495 = vmatpush.bf16.msra.mxu0 %v2353_v29  ;;  %1188 = vmatpush.bf16.msrb.mxu3 %v2221_v36  ;;  %v2341_v61 = vor.u32 %v2688_v51, %v2338_v59  ;;  %v2317_v29 = vor.u32 %v2682_v26, %v2314_v27  ;;  %v2377_v34 = vor.u32 %v2699_v33, %v2376_v32  ;;  %v2306_v36 = vld [vmem:[#allocation11 + $0x18] sm:$0xf0]  ;;  %v2724_v59 = vld [vmem:[#allocation11 + $0x174] sm:$0xf]  ;;  %v2458_v27 = vld [vmem:[#allocation11 + $0x148] sm:$0xf0] }
  0xe8   :  { %1508 = vmatpush.bf16.msra.mxu1 %v2417_v31  ;;  %v2413_v31 = vor.u32 %v2706_v28, %v2410_v30  ;;  %v2309_v38 = vor.u32 %v2680_v35, %v2306_v36  ;;  %v2386_v51 = vld [vmem:[#allocation11 + $0xb8] sm:$0xf0]  ;;  %v2365_v26 = vor.u32 %v2694_v23, %v2362_v24  ;;  %v2717_v30 = vld [vmem:[#allocation11 + $0x134] sm:$0xf0] }
  0xe9   :  { %1164 = vmatmul.bf16.vlgmr.msrb.gmra.mxu1 %v3029_v56  ;;  %v2320_v56 = vld [vmem:[#allocation11 + $0x30] sm:$0xf] }
  0xea   :  { %1176 = vmatpush.bf16.msrb.mxu2 %v2113_v45  ;;  %v2321_v62 = vor.u32 %v2685_v60, %v2320_v56  ;;  %v2298_v45 = vld [vmem:[#allocation11 + $0x8] sm:$0xf0]  ;;  %v2482_v56 = vld [vmem:[#allocation11 + $0x178] sm:$0xf0] }
  0xeb   :  { %1496 = vmatpush.bf16.msra.mxu0 %v2345_v41  ;;  %1189 = vmatpush.bf16.msrb.mxu3 %v2209_v48  ;;  %v2368_v41 = vld [vmem:[#allocation11 + $0x90] sm:$0xf]  ;;  %v2394_v48 = vld [vmem:[#allocation11 + $0xc8] sm:$0xf0] }
  0xec   :  { %1509 = vmatpush.bf16.msra.mxu1 %v2409_v44  ;;  %v2369_v43 = vor.u32 %v2697_v42, %v2368_v41  ;;  %v2678_v44 = vld [vmem:[#allocation11 + $0x4] sm:$0xf] }
  0xed   :  { %1177 = vmatmul.bf16.vlgmr.msrb.gmra.mxu2 %v3033_v14  ;;  %v2681_v14 = vld [vmem:[#allocation11 + $0x14] sm:$0xf0]  ;;  %v2301_v46 = vor.u32 %v2678_v44, %v2298_v45 }
  0xee   :  { %1190 = vmatmul.bf16.vlgmr.msrb.gmra.mxu3 %v3035_v20  ;;  %v2305_v4 = vor.u32 %v2681_v14, %v2304_v2  ;;  %v2401_v20 = vor.u32 %v2705_v5, %v2400_v3  ;;  %v2378_v2 = vld [vmem:[#allocation11 + $0xa8] sm:$0xf0]  ;;  %v2722_v14 = vld [vmem:[#allocation11 + $0x164] sm:$0xf] }
  0xef   :  { %1534 = vmatpush.bf16.msra.mxu3 %v2357_v49  ;;  %1497 = vmatpush.bf16.msra.mxu0 %v2337_v50  ;;  %v2397_v49 = vor.u32 %v2702_v47, %v2394_v48  ;;  %v2360_v50 = vld [vmem:[#allocation11 + $0x80] sm:$0xf]  ;;  %v2474_v3 = vld [vmem:[#allocation11 + $0x168] sm:$0xf0]  ;;  %v2713_v47 = vld [vmem:[#allocation11 + $0x114] sm:$0xf0] }
  0xf0   :  { %1510 = vmatpush.bf16.msra.mxu1 %v2401_v20  ;;  %v2361_v53 = vor.u32 %v2695_v52, %v2360_v50  ;;  %v2477_v5 = vor.u32 %v2722_v14, %v2474_v3  ;;  %v2721_v20 = vld [vmem:[#allocation11 + $0x154] sm:$0xf0]  ;;  %v2712_v48 = vld [vmem:[#allocation11 + $0x114] sm:$0xf] }
  0xf1   :  { %v2465_v9 = vor.u32 %v2721_v20, %v2464_v7 }
  0xf3   :  { %1535 = vmatpush.bf16.msra.mxu3 %v2349_v57  ;;  %1498 = vmatpush.bf16.msra.mxu0 %v2329_v58  ;;  %v2700_v57 = vld [vmem:[#allocation11 + $0xb4] sm:$0xf]  ;;  %v2481_v58 = vor.u32 %v2725_v55, %v2480_v54 }
  0xf4   :  { %1511 = vmatpush.bf16.msra.mxu1 %v2393_v17  ;;  %v2389_v60 = vor.u32 %v2700_v57, %v2386_v51  ;;  %v521_v17 = vperm.slane %v3050_v6, 0  ;;  %v2424_v51 = vld [vmem:[#allocation11 + $0x100] sm:$0xf] }
  0xf5   :  { %1521 = vmatpush.bf16.msra.mxu2 %v2481_v58 }
  0xf7   :  { %1536 = vmatpush.bf16.msra.mxu3 %v2341_v61  ;;  %1499 = vmatpush.bf16.msra.mxu0 %v2321_v62  ;;  %v2485_v61 = vor.u32 %v2724_v59, %v2482_v56  ;;  %v2472_v62 = vld [vmem:[#allocation11 + $0x160] sm:$0xf]  ;;  %v2711_v59 = vld [vmem:[#allocation11 + $0x104] sm:$0xf0]  ;;  %v2710_v56 = vld [vmem:[#allocation11 + $0x104] sm:$0xf] }
  0xf8   :  { %1512 = vmatpush.bf16.msra.mxu1 %v2385_v25  ;;  %v2718_v25 = vld [vmem:[#allocation11 + $0x144] sm:$0xf] }
  0xf9   :  { %v2461_v28 = vor.u32 %v2718_v25, %v2458_v27 }
  0xfb   :  { %1500 = vmatpush.bf16.msra.mxu0 %v2313_v1  ;;  %1537 = vmatpush.bf16.msra.mxu3 %v2333_v8  ;;  %v2473_v1 = vor.u32 %v2723_v63, %v2472_v62  ;;  %v2696_v8 = vld [vmem:[#allocation11 + $0x94] sm:$0xf]  ;;  %v2426_v62 = vld [vmem:[#allocation11 + $0x108] sm:$0xf0] }
  0xfc   :  { %1513 = vmatpush.bf16.msra.mxu1 %v2377_v34  ;;  %v2373_v13 = vor.u32 %v2696_v8, %v2370_v10  ;;  %v2450_v34 = vld [vmem:[#allocation11 + $0x138] sm:$0xf0]  ;;  %v2429_v63 = vor.u32 %v2710_v56, %v2426_v62 }
  0xfd   :  { %1522 = vmatpush.bf16.msra.mxu2 %v2473_v1  ;;  %v522_v1 = vperm.slane %v3050_v6, 1 }
  0xff   :  { %1501 = vmatpush.bf16.msra.mxu0 %v2305_v4  ;;  %1538 = vmatpush.bf16.msra.mxu3 %v2325_v18  ;;  %v2381_v4 = vor.u32 %v2698_v0, %v2378_v2 }
 0x100   :  { %1514 = vmatpush.bf16.msra.mxu1 %v2369_v43  ;;  %v2442_v43 = vld [vmem:[#allocation11 + $0x128] sm:$0xf0] }
 0x101   :  { %1523 = vmatpush.bf16.msra.mxu2 %v2465_v9 }
 0x103   :  { %1502 = vmatpush.bf16.msra.mxu0 %v2297_v12  ;;  %1539 = vmatpush.bf16.msra.mxu3 %v2317_v29  ;;  %v2466_v12 = vld [vmem:[#allocation11 + $0x158] sm:$0xf0]  ;;  %v2448_v29 = vld [vmem:[#allocation11 + $0x130] sm:$0xf] }
 0x104   :  { %1515 = vmatpush.bf16.msra.mxu1 %v2361_v53  ;;  %v2469_v15 = vor.u32 %v2720_v11, %v2466_v12  ;;  %v2449_v33 = vor.u32 %v2717_v30, %v2448_v29  ;;  %v2434_v53 = vld [vmem:[#allocation11 + $0x118] sm:$0xf0] }
 0x105   :  { %v2437_v54 = vor.u32 %v2712_v48, %v2434_v53 }
 0x107   :  { %1547 = vmatpush.bf16.msrb.mxu0 %v2421_v22  ;;  %1540 = vmatpush.bf16.msra.mxu3 %v2309_v38  ;;  %v2457_v22 = vor.u32 %v2719_v21, %v2456_v19  ;;  %v2440_v38 = vld [vmem:[#allocation11 + $0x120] sm:$0xf] }
 0x108   :  { %1560 = vmatpush.bf16.msrb.mxu1 %v2485_v61  ;;  %v2441_v42 = vor.u32 %v2715_v39, %v2440_v38  ;;  %v2425_v61 = vor.u32 %v2711_v59, %v2424_v51  ;;  %v2737_v38 = vld [vmem:[#allocation12 + $0x58] sm:$0xff]  ;;  %v2730_v39 = vld [vmem:[#allocation12 + $0x20] sm:$0xff] }
 0x109   :  { %1524 = vmatpush.bf16.msra.mxu2 %v2457_v22 }
 0x10b   :  { %1548 = vmatpush.bf16.msrb.mxu0 %v2413_v31  ;;  %1541 = vmatpush.bf16.msra.mxu3 %v2301_v46  ;;  %v2716_v31 = vld [vmem:[#allocation11 + $0x134] sm:$0xf]  ;;  %v2432_v46 = vld [vmem:[#allocation11 + $0x110] sm:$0xf] }
 0x10c   :  { %1561 = vmatpush.bf16.msrb.mxu1 %v2477_v5  ;;  %v2453_v35 = vor.u32 %v2716_v31, %v2450_v34  ;;  %v2433_v52 = vor.u32 %v2713_v47, %v2432_v46  ;;  %v2739_v34 = vld [vmem:[#allocation12 + $0x68] sm:$0xff] }
 0x10d   :  { %1525 = vmatpush.bf16.msra.mxu2 %v2449_v33  ;;  %v2733_v33 = vld [vmem:[#allocation12 + $0x38] sm:$0xff]  ;;  %v2727_v46 = vld [vmem:[#allocation12 + $0x8] sm:$0xff] }
 0x10f   :  { %1549 = vmatpush.bf16.msrb.mxu0 %v2405_v40  ;;  %v2714_v40 = vld [vmem:[#allocation11 + $0x124] sm:$0xf] }
 0x110   :  { %1562 = vmatpush.bf16.msrb.mxu1 %v2469_v15  ;;  %v2445_v44 = vor.u32 %v2714_v40, %v2442_v43  ;;  %v2736_v40 = vld [vmem:[#allocation12 + $0x50] sm:$0xff] }
 0x111   :  { %1526 = vmatpush.bf16.msra.mxu2 %v2441_v42  ;;  %v2735_v42 = vld [vmem:[#allocation12 + $0x48] sm:$0xff] }
 0x113   :  { %1550 = vmatpush.bf16.msrb.mxu0 %v2397_v49 }
 0x114   :  { %1563 = vmatpush.bf16.msrb.mxu1 %v2461_v28 }
 0x115   :  { %1527 = vmatpush.bf16.msra.mxu2 %v2433_v52 }
 0x117   :  { %1551 = vmatpush.bf16.msrb.mxu0 %v2389_v60 }
 0x118   :  { %1564 = vmatpush.bf16.msrb.mxu1 %v2453_v35  ;;  %v2732_v35 = vld [vmem:[#allocation12 + $0x30] sm:$0xff] }
 0x119   :  { %1528 = vmatpush.bf16.msra.mxu2 %v2425_v61 }
 0x11b   :  { %1552 = vmatpush.bf16.msrb.mxu0 %v2381_v4 }
 0x11c   :  { %1565 = vmatpush.bf16.msrb.mxu1 %v2445_v44  ;;  %v2728_v44 = vld [vmem:[#allocation12 + $0x10] sm:$0xff] }
 0x11d   :  { %1709 = vmatpush.bf16.msrb.mxu2 %v2733_v33 }
 0x11f   :  { %1553 = vmatpush.bf16.msrb.mxu0 %v2373_v13 }
 0x120   :  { %1566 = vmatpush.bf16.msrb.mxu1 %v2437_v54  ;;  %v1249_v54 = vld [vmem:[%s3070_s6] sm:$0x3] }
 0x121   :  { %1710 = vmatpush.bf16.msrb.mxu2 %v2732_v35  ;;  %v1251_v59 = vperm.slane %v1249_v54, 0 }
 0x123   :  { %1554 = vmatpush.bf16.msrb.mxu0 %v2365_v26 }
 0x124   :  { %1567 = vmatpush.bf16.msrb.mxu1 %v2429_v63 }
 0x142   :  { %v1048_v16 = vpop.f32.mrf.mxu0 }
 0x143   :  { %v1061_v18 = vpop.f32.mrf.mxu1  ;;  %v1049_v32 = vadd.f32 %v1048_v16, %v521_v17  ;;  %v523_v16 = vperm.slane %v3050_v6, 2  ;;  %v2740_v6 = vld [vmem:[#allocation12 + $0x70] sm:$0xff] }
 0x145   :  { %v1062_v41 = vadd.f32 %v1061_v18, %v1049_v32  ;;  %v2741_v32 = vld [vmem:[#allocation12 + $0x78] sm:$0xff] }
 0x146   :  { %1722 = vmatpush.bf16.msrb.mxu3 %v2741_v32 }
 0x14a   :  { %v1050_v36 = vpop.f32.mrf.mxu0  ;;  %1723 = vmatpush.bf16.msrb.mxu3 %v2740_v6 }
 0x14b   :  { %v1063_v37 = vpop.f32.mrf.mxu1  ;;  %v2738_v36 = vld [vmem:[#allocation12 + $0x60] sm:$0xff] }
 0x14c   :  { %v2731_v37 = vld [vmem:[#allocation12 + $0x28] sm:$0xff] }
 0x14d   :  { %1711 = vmatpush.bf16.msrb.mxu2 %v2731_v37 }
 0x14e   :  { %1724 = vmatpush.bf16.msrb.mxu3 %v2739_v34 }
 0x150   :  { %v1074_v45 = vpop.f32.mrf.mxu2 }
 0x151   :  { %v1075_v49 = vadd.f32 %v1074_v45, %v1062_v41  ;;  %v1087_v50 = vpop.f32.mrf.mxu3  ;;  %1712 = vmatpush.bf16.msrb.mxu2 %v2730_v39  ;;  %v2729_v41 = vld [vmem:[#allocation12 + $0x18] sm:$0xff]  ;;  %v2734_v45 = vld [vmem:[#allocation12 + $0x40] sm:$0xff] }
 0x152   :  { %v1100_v57 = vpop.f32.mrf.mxu0  ;;  %1725 = vmatpush.bf16.msrb.mxu3 %v2738_v36 }
 0x153   :  { %v1088_v55 = vadd.f32 %v1087_v50, %v1075_v49  ;;  %v1113_v58 = vpop.f32.mrf.mxu1  ;;  %v1101_v3 = vadd.f32 %v1100_v57, %v522_v1  ;;  %v2726_v49 = vld [vmem:[#allocation12] sm:$0xff] }
 0x155   :  { %v1195_v60 = vmax.f32 %v1088_v55, 0.0  ;;  %v1114_v7 = vadd.f32 %v1113_v58, %v1101_v3  ;;  %1713 = vmatpush.bf16.msrb.mxu2 %v2729_v41  ;;  %v1252_v58 = vperm.slane %v1249_v54, 1 }
 0x156   :  { %1726 = vmatpush.bf16.msrb.mxu3 %v2737_v38 }
 0x157   :  { %v1198_v0 = vpack.c.bf16 %v1195_v60, %v1195_v60 }
 0x158   :  { %v1076_v2 = vpop.f32.mrf.mxu2 }
 0x159   :  { %v1089_v14 = vpop.f32.mrf.mxu3  ;;  %1503 = vmatmul.bf16.vlgmr.msra.gmra.mxu0 %v1198_v0  ;;  %1542 = vmatmul.bf16.vlgmr.msra.gmra.mxu3 %v1198_v0 }
 0x15a   :  { %v1102_v4 = vpop.f32.mrf.mxu0  ;;  %1727 = vmatpush.bf16.msrb.mxu3 %v2736_v40  ;;  %1714 = vmatpush.bf16.msrb.mxu2 %v2728_v44 }
 0x15b   :  { %v1115_v5 = vpop.f32.mrf.mxu1 }
 0x15e   :  { %1728 = vmatpush.bf16.msrb.mxu3 %v2735_v42  ;;  %1715 = vmatpush.bf16.msrb.mxu2 %v2727_v46 }
 0x160   :  { %v1126_v20 = vpop.f32.mrf.mxu2 }
 0x161   :  { %v1127_v8 = vadd.f32 %v1126_v20, %v1114_v7  ;;  %v1139_v9 = vpop.f32.mrf.mxu3 }
 0x162   :  { %1729 = vmatpush.bf16.msrb.mxu3 %v2734_v45  ;;  %1716 = vmatpush.bf16.msrb.mxu2 %v2726_v49 }
 0x163   :  { %v1140_v10 = vadd.f32 %v1139_v9, %v1127_v8  ;;  %v1152_v11 = vpop.f32.mrf.mxu0  ;;  %v2758_v8 = vld [vmem:[%s3072_s8] ss:$0 sm:$0xff]  ;;  %s2958_s8 = smov [#allocation14]  }
 0x164   :  { %v1153_v19 = vadd.f32 %v1152_v11, %v523_v16  ;;  %s1767_s23 = sshll.u32 %s2958_s8, 4  ;;  %s1768_s23 = int_to_ptr.vmem [resolvable:$true] %s1767_s23 }
 0x165   :  { %v1196_v12 = vmax.f32 %v1140_v10, 0.0 }
 0x166   :  { %v1165_v13 = vpop.f32.mrf.mxu1 }
 0x167   :  { %v1199_v15 = vpack.c.bf16 %v1196_v12, %v1196_v12  ;;  %v1166_v23 = vadd.f32 %v1165_v13, %v1153_v19 }
 0x168   :  { %v1128_v17 = vpop.f32.mrf.mxu2 }
 0x169   :  { %v1141_v18 = vpop.f32.mrf.mxu3  ;;  %1516 = vmatmul.bf16.vlgmr.msra.gmra.mxu1 %v1199_v15  ;;  %1555 = vmatmul.bf16.vlgmr.msrb.gmra.mxu0 %v1199_v15 }
 0x16b   :  { %v1154_v21 = vpop.f32.mrf.mxu0 }
 0x16e   :  { %v1167_v22 = vpop.f32.mrf.mxu1 }
 0x16f   :  { %v1735_v22 = vlaneseq }
 0x170   :  { %v1178_v24 = vpop.f32.mrf.mxu2 }
 0x171   :  { %v1179_v25 = vadd.f32 %v1178_v24, %v1166_v23  ;;  %v1191_v26 = vpop.f32.mrf.mxu3 }
 0x173   :  { %v1192_v27 = vadd.f32 %v1191_v26, %v1179_v25  ;;  %v1736_v25 = vand.u32 127, %v1735_v22 }
 0x175   :  { %v1197_v28 = vmax.f32 %v1192_v27, 0.0  ;;  %vm1738_vm2 = vcmp.lt.s32.totalorder %v1736_v25, 16  ;;  %vm1737_vm3 = vcmp.lt.s32.totalorder %v1736_v25, 8 }
 0x177   :  { %v1200_v29 = vpack.c.bf16 %v1197_v28, %v1197_v28 }
 0x178   :  { %v1180_v30 = vpop.f32.mrf.mxu2 }
 0x179   :  { %v1193_v31 = vpop.f32.mrf.mxu3  ;;  %1529 = vmatmul.bf16.vlgmr.msra.gmra.mxu2 %v1200_v29  ;;  %1568 = vmatmul.bf16.vlgmr.msrb.gmra.mxu1 %v1200_v29 }
 0x1d6   :  { %v1504_v43 = vpop.f32.mrf.mxu0 }
 0x1d7   :  { %v1505_v62 = vadd.f32 %v1504_v43, %v1251_v59 }
 0x1dc   :  { %v1543_v47 = vpop.f32.mrf.mxu3 }
 0x1dd   :  { %v1544_v51 = vadd.f32 %v1543_v47, %v1252_v58 }
 0x1de   :  { %v1506_v48 = vpop.f32.mrf.mxu0 }
 0x1e4   :  { %v1545_v50 = vpop.f32.mrf.mxu3 }
 0x1e6   :  { %v1517_v52 = vpop.f32.mrf.mxu1  ;;  %v1556_v53 = vpop.f32.mrf.mxu0 }
 0x1e7   :  { %v1557_v56 = vadd.f32 %v1556_v53, %v1544_v51  ;;  %v1518_v0 = vadd.f32 %v1517_v52, %v1505_v62 }
 0x1ee   :  { %v1519_v55 = vpop.f32.mrf.mxu1  ;;  %v1558_v57 = vpop.f32.mrf.mxu0 }
 0x1f6   :  { %v1569_v60 = vpop.f32.mrf.mxu1 }
 0x1f7   :  { %v1570_v61 = vadd.f32 %v1569_v60, %v1557_v56 }
 0x1f9   :  { %v1574_v63 = vmax.f32 %v1570_v61, 0.0 }
 0x1fb   :  { %v1576_v1 = vpack.c.bf16 %v1574_v63, %v1574_v63 }
 0x1fc   :  { %v1530_v2 = vpop.f32.mrf.mxu2 }
 0x1fd   :  { %v1531_v14 = vadd.f32 %v1530_v2, %v1518_v0  ;;  %1730 = vmatmul.bf16.vlgmr.msrb.gmra.mxu3 %v1576_v1 }
 0x1fe   :  { %v1571_v3 = vpop.f32.mrf.mxu1 }
 0x1ff   :  { %v1573_v4 = vmax.f32 %v1531_v14, 0.0 }
 0x201   :  { %v1575_v5 = vpack.c.bf16 %v1573_v4, %v1573_v4 }
 0x203   :  { %1717 = vmatmul.bf16.vlgmr.msrb.gmra.mxu2 %v1575_v5 }
 0x204   :  { %v1532_v7 = vpop.f32.mrf.mxu2 }
 0x280   :  { %v1731_v20 = vpop.f32.mrf.mxu3 }
 0x286   :  { %v1718_v9 = vpop.f32.mrf.mxu2 }
 0x287   :  { %v1719_v10 = vadd.f32 %v2758_v8, %v1718_v9 }
 0x288   :  { %v1733_v11 = vpop.f32.mrf.mxu3 }
 0x289   :  { %v1732_v12 = vadd.f32 %v1731_v20, %v1719_v10 }
 0x28b   :  { %v1741_v13 = vand.u32 2147483647, %v1732_v12  ;;  %v1740_v29 = vmax.f32 %v1732_v12, 0.0 }
 0x28d   :  { %v1742_v15 = vsub.f32 0.0, %v1741_v13 }
 0x28e   :  { %v1720_v16 = vpop.f32.mrf.mxu2 }
 0x28f   :  { %v1743_v17 = vmul.f32 1.442695, %v1742_v15 }
 0x291   :  { %2759 = vpow2.f32 %v1743_v17 }
 0x297   :  { %v2760_v18 = vpop.eup %2759 }
 0x298   :  { %v1745_v19 = vadd.f32 1.0, %v2760_v18  ;;  %v1748_v21 = vmul.f32 -0.5, %v2760_v18  ;;  %v1751_v24 = vand.u32 2147483647, %v2760_v18 }
 0x29a   :  { %2761 = vlog2.f32 %v1745_v19  ;;  %v1749_v23 = vadd.f32 1.0, %v1748_v21  ;;  %vm1752_vm1 = vcmp.lt.f32.partialorder %v1751_v24, 0.0004427343 }
 0x29b   :  { %2763 = vtanh.f32 %v1732_v12 }
 0x29c   :  { %v1750_v28 = vmul.f32 %v2760_v18, %v1749_v23 }
 0x2a0   :  { %v2762_v26 = vpop.eup %2761 }
 0x2a1   :  { %v1747_v27 = vmul.f32 0.6931472, %v2762_v26  ;;  %v2764_v32 = vpop.eup %2763 }
 0x2a3   :  { %v1753_v30 = vsel %vm1752_vm1, %v1750_v28, %v1747_v27 }
 0x2a4   :  { %v1754_v31 = vadd.f32 %v1753_v30, %v1740_v29 }
 0x2a6   :  { %v1757_v6 = vsel %vm1738_vm2, %v1754_v31, %v1732_v12 }
 0x2a7   :  { %v1760_v33 = vsel %vm1737_vm3, %v2764_v32, %v1757_v6 }
 0x2a8   :  { %1761 = vst [vmem:[#allocation14] sm:$0xff] %v1760_v33 }
 0x2a9   :  { %1772 = dma.vmem_to_hbm [thread:$0]  %s1768_s23, 128, %s1770_s26, [#allocation5]  }
 0x2aa   :  { %2941 = dma.done.wait [#allocation5], 128  }
 0x2ab   :  { %2942 = vsyncadd [#allocation5], 4294967168 }
 0x2ac   :  { %1777 = vsyncpa [#allocation4], 1 }
 0x2ad   :  { %1778 = vsyncpa [#allocation7], 1 }
 0x2ae   :  { %1779 = vsyncpa [#allocation10], 1 }
 0x2af   :  { %1780 = vsyncpa [#allocation13], 1 }
 0x2b0   :  { %1781 = vsyncpa [#allocation5], 1 }

</bundles_post_ra>
